<compile_context>
chip_gen: v5e
topology: v5e:2x2
jax: 0.10.0
libtpu: 0.0.40
codegen_flags: <defaults>
</compile_context>

<pallas_src>
import functools

import jax
import jax.numpy as jnp
from jax.experimental import pallas as pl
from jax.experimental.pallas import tpu as pltpu


def _round_up(x, m):
    return ((x + m - 1) // m) * m


def _extract_topk(vals, idxs, k):
    """Iterative top-k over the last axis (usable inside and outside kernels).

    vals: (B, W) f32, idxs: (B, W) i32 global indices (unique per row among
    finite-valued entries).  Returns ((B, k) values desc-sorted, (B, k) idx),
    ties broken by the lowest global index (FAISS / lax.top_k semantics)."""
    out_v, out_i = [], []
    cur = vals
    for _ in range(k):
        m = jnp.max(cur, axis=-1, keepdims=True)                      # (B, 1)
        hit = cur == m
        sel = jnp.min(jnp.where(hit, idxs, jnp.int32(2 ** 30)),
                      axis=-1, keepdims=True)                         # (B, 1)
        out_v.append(m)
        out_i.append(sel)
        cur = jnp.where(idxs == sel, -jnp.inf, cur)
    return jnp.concatenate(out_v, axis=-1), jnp.concatenate(out_i, axis=-1)


def _retrieve_kernel(q_ref, c_ref, vals_ref, idx_ref, topv_sc, topi_sc,
                     *, k, sub, n_valid, n_pad):
    """One corpus tile: per-sub-window bf16 MXU matmul + threshold-gated
    streaming top-k merge in VMEM scratch; emit per-split (D, I) at the last
    tile of this split."""
    c = pl.program_id(0)                 # corpus split (megacore) index
    i = pl.program_id(1)                 # corpus tile index within the split
    n_sub = c_ref.shape[0]               # sub-windows per tile
    b_pad = q_ref.shape[0]
    tiles_per_split = pl.num_programs(1)

    @pl.when(i == 0)
    def _init():
        topv_sc[...] = jnp.full((b_pad, k), -jnp.inf, jnp.float32)
        # Distinct, out-of-range init indices (never selected once >= k real
        # candidates exist; disjoint across splits so the wrapper-side merge
        # never sees duplicate indices).
        topi_sc[...] = (n_pad + c * k +
                        jax.lax.broadcasted_iota(jnp.int32, (b_pad, k), 1))

    # Resident f32 query, cast once per tile (tiny); corpus streamed as bf16.
    q = q_ref[...].astype(jnp.bfloat16)                               # (B, D)
    tile_base = (c * tiles_per_split + i) * (n_sub * sub)

    def body(w, carry):
        # Scores for one sub-window: lane-dense (B, sub) f32 MXU output.
        s = jnp.dot(q, c_ref[w], preferred_element_type=jnp.float32)

        # Threshold gate: run the k-pass top-k only if some row can improve on
        # its current k-th best.  Strict '>' also preserves the FAISS
        # lowest-index tie-break (equal-valued later candidates lose anyway).
        kth = topv_sc[...][:, k - 1:k]                                # (B, 1)
        improve = jnp.where(s > kth, 1.0, 0.0)

        @pl.when(jnp.max(improve) > 0.0)
        def _update():
            gcol = (tile_base + w * sub +
                    jax.lax.broadcasted_iota(jnp.int32, s.shape, 1))
            # Corpus-padding mask only pays inside the (rare) gated branch.
            sm = jnp.where(gcol < n_valid, s, -jnp.inf)
            lv, li = _extract_topk(sm, gcol, k)
            # Cheap k-vs-k merge with the running accumulator; accumulator
            # entries carry lower global indices so first-occurrence wins.
            mv, mi = _extract_topk(
                jnp.concatenate([topv_sc[...], lv], axis=-1),
                jnp.concatenate([topi_sc[...], li], axis=-1), k)
            topv_sc[...] = mv
            topi_sc[...] = mi

        return carry

    jax.lax.fori_loop(0, n_sub, body, 0, unroll=min(8, n_sub))

    @pl.when(i == tiles_per_split - 1)
    def _finalize():
        vals_ref[0] = topv_sc[...]        # per-split D : (B, k)
        idx_ref[0] = topi_sc[...]         # per-split I : (B, k)


@functools.partial(jax.jit,
                   static_argnames=("k", "sub", "n_valid", "n_pad",
                                    "tiles_per_split", "num_splits"))
def _retrieve(q_emb, corpus_windows, *, k, sub, n_valid, n_pad,
              tiles_per_split, num_splits):
    """q_emb (B, D) f32, corpus_windows (n_windows, D, sub) bf16 ->
    (probs (B, k) f32, indices (B, k) i32)."""
    B, D = q_emb.shape
    n_sub = (n_pad // num_splits // tiles_per_split) // sub

    # F.normalize(q_emb, p=2, dim=-1) -- hoisted out of the per-tile loop.
    qn = q_emb / jnp.maximum(
        jnp.linalg.norm(q_emb, axis=-1, keepdims=True), 1e-12)
    b_pad = _round_up(max(B, 8), 8)
    q_p = jnp.pad(qn, ((0, b_pad - B), (0, 0)))   # stays f32 (tiny, resident)

    kernel = functools.partial(_retrieve_kernel, k=k, sub=sub,
                               n_valid=n_valid, n_pad=n_pad)

    vals, idx = pl.pallas_call(
        kernel,
        out_shape=(
            jax.ShapeDtypeStruct((num_splits, b_pad, k), jnp.float32),
            jax.ShapeDtypeStruct((num_splits, b_pad, k), jnp.int32),
        ),
        grid_spec=pltpu.PrefetchScalarGridSpec(
            num_scalar_prefetch=0,
            grid=(num_splits, tiles_per_split),
            in_specs=[
                # resident query block
                pl.BlockSpec((b_pad, D), lambda c, i: (0, 0)),
                # streamed corpus tile: n_sub lane-dense (D, sub) windows
                pl.BlockSpec((n_sub, D, sub),
                             lambda c, i: (c * tiles_per_split + i, 0, 0)),
            ],
            out_specs=[
                pl.BlockSpec((1, b_pad, k), lambda c, i: (c, 0, 0)),
                pl.BlockSpec((1, b_pad, k), lambda c, i: (c, 0, 0)),
            ],
            scratch_shapes=[
                pltpu.VMEM((b_pad, k), jnp.float32),   # running top-k values
                pltpu.VMEM((b_pad, k), jnp.int32),     # running top-k indices
            ],
        ),
        compiler_params=pltpu.CompilerParams(
            dimension_semantics=("parallel", "arbitrary")),
        cost_estimate=pl.CostEstimate(
            flops=2 * b_pad * n_pad * D,
            transcendentals=0,
            bytes_accessed=n_pad * D * 2 + b_pad * D * 4
                           + num_splits * b_pad * k * 8),
    )(q_p, corpus_windows)

    # Merge per-split candidates (num_splits*k per row); global indices plus
    # lowest-index tie-break preserve FAISS first-occurrence semantics.
    vals_m = jnp.transpose(vals, (1, 0, 2)).reshape(b_pad, num_splits * k)[:B]
    idx_m = jnp.transpose(idx, (1, 0, 2)).reshape(b_pad, num_splits * k)[:B]
    if num_splits > 1:
        d, top_idx = _extract_topk(vals_m, idx_m, k)
    else:
        d, top_idx = vals_m, idx_m

    # sims = F.normalize(D, p=2, dim=-1); probs = softmax(sims)  (tiny, exact)
    sims = d / jnp.maximum(jnp.linalg.norm(d, axis=-1, keepdims=True), 1e-12)
    probs = jax.nn.softmax(sims, axis=-1)
    return probs, top_idx


class PallasRetriever:
    """Pallas analogue of `Retriever`: corpus-side work (pad, bf16 cast,
    window-major layout) is done once at construction, like building the FAISS
    index; __call__ maps query embeddings to (probs, indices).

    num_splits=2 shards the corpus scan over both TensorCores on v7x
    (harmless on single-core v5e/v6e)."""

    def __init__(self, corpus_emb, *, k=4, tn=16384, sub=512, num_splits=1):
        corpus_emb = jnp.asarray(corpus_emb, jnp.float32)
        N, D = corpus_emb.shape
        assert N >= k >= 1
        assert num_splits >= 1
        per_split = -(-N // num_splits)                       # ceil
        tn_eff = min(_round_up(tn, sub), _round_up(per_split, sub))
        tiles_per_split = -(-per_split // tn_eff)             # ceil
        n_pad = num_splits * tiles_per_split * tn_eff
        n_windows = n_pad // sub
        # One-time (cached) corpus prep: pad rows, cast to bf16 and lay out as
        # lane-dense (window, D, sub) slabs for the streamed MXU RHS.
        cw = jnp.pad(corpus_emb, ((0, n_pad - N), (0, 0))).astype(jnp.bfloat16)
        cw = cw.reshape(n_windows, sub, D).transpose(0, 2, 1)
        self._corpus_windows = cw
        self._static = dict(k=k, sub=sub, n_valid=N, n_pad=n_pad,
                            tiles_per_split=tiles_per_split,
                            num_splits=num_splits)

    def __call__(self, q_emb):
        return _retrieve(jnp.asarray(q_emb, jnp.float32),
                         self._corpus_windows, **self._static)


if __name__ == "__main__":
    B, D, N, K = 2, 32, 1000, 4
    key = jax.random.PRNGKey(0)
    kq, kc = jax.random.split(key)

    # Deterministic stand-ins: query-encoder output and the corpus embedding
    # table (what `IndexFlatIP.add(emb_np)` would hold).
    q_emb = jax.random.normal(kq, (B, D), dtype=jnp.float32)
    corpus_emb = jax.random.normal(kc, (N, D), dtype=jnp.float32)

    # Pure-JAX reference of the same forward semantics (matched bf16 operands).
    qn = q_emb / jnp.maximum(
        jnp.linalg.norm(q_emb, axis=-1, keepdims=True), 1e-12)
    sc = jax.lax.dot_general(
        qn.astype(jnp.bfloat16), corpus_emb.astype(jnp.bfloat16),
        dimension_numbers=(((1,), (1,)), ((), ())),
        preferred_element_type=jnp.float32)
    d_ref, i_ref = jax.lax.top_k(sc, K)
    sims_ref = d_ref / jnp.maximum(
        jnp.linalg.norm(d_ref, axis=-1, keepdims=True), 1e-12)
    p_ref = jax.nn.softmax(sims_ref, axis=-1)

    # Exercise both the single-core path and the v7x two-split path.
    for ns in (1, 2):
        retriever = PallasRetriever(corpus_emb, k=K, tn=16384, num_splits=ns)
        probs, idx = retriever(q_emb)
        jax.block_until_ready((probs, idx))
        assert probs.shape == (B, K) and idx.shape == (B, K)
        assert bool((idx == i_ref).all()), (ns, idx, i_ref)
        assert jnp.allclose(probs, p_ref, atol=2e-3), (ns, probs, p_ref)

    print("KERNEL_OK")
</pallas_src>

<mosaic_0001>
module attributes {stable_mosaic.version = 11 : i64} {
  func.func @_retrieve_kernel(%arg0: i32, %arg1: i32, %arg2: memref<8x32xf32, #tpu.memory_space<vmem>>, %arg3: memref<2x32x512xbf16, #tpu.memory_space<vmem>>, %arg4: memref<1x8x4xf32, #tpu.memory_space<vmem>>, %arg5: memref<1x8x4xi32, #tpu.memory_space<vmem>>, %arg6: memref<8x4xf32, #tpu.memory_space<vmem>>, %arg7: memref<8x4xi32, #tpu.memory_space<vmem>>) attributes {dimension_semantics = [#tpu.dimension_semantics<parallel>, #tpu.dimension_semantics<arbitrary>], iteration_bounds = array<i64: 1, 1>, scalar_prefetch = 0 : i64, scratch_operands = 2 : i64, tpu.core_type = #tpu.core_type<tc>, window_params = [{pipeline_mode = #tpu.pipeline_mode<synchronous>, transform_indices = @transform_0, window_bounds = array<i64: 8, 32>}, {transform_indices = @transform_1, window_bounds = array<i64: 2, 32, 512>}, {transform_indices = @transform_2, window_bounds = array<i64: 1, 8, 4>}, {transform_indices = @transform_3, window_bounds = array<i64: 1, 8, 4>}]} {
    %c0_i32 = arith.constant 0 : i32
    %0 = arith.cmpi eq, %arg1, %c0_i32 : i32
    %1 = arith.extui %0 : i1 to i32
    %c0_i32_0 = arith.constant 0 : i32
    %2 = arith.cmpi ne, %1, %c0_i32_0 : i32
    scf.if %2 {
      %cst_25 = arith.constant 0xFF800000 : f32
      %47 = vector.broadcast %cst_25 : f32 to vector<8x4xf32>
      %c0_26 = arith.constant 0 : index
      %c0_27 = arith.constant 0 : index
      %48 = vector.load %arg6[%c0_26, %c0_27] : memref<8x4xf32, #tpu.memory_space<vmem>>, vector<8x4xf32>
      tpu.vector_store %arg6[%c0_26, %c0_27], %47 {strides = array<i32>} : memref<8x4xf32, #tpu.memory_space<vmem>>, vector<8x4xf32>,
      %c4_i32 = arith.constant 4 : i32
      %49 = arith.muli %arg0, %c4_i32 : i32
      %c1024_i32_28 = arith.constant 1024 : i32
      %50 = arith.addi %c1024_i32_28, %49 : i32
      %51 = tpu.iota {dimensions = array<i32: 1>} : vector<8x4xi32>
      %52 = vector.broadcast %50 : i32 to vector<8x4xi32>
      %53 = arith.addi %52, %51 : vector<8x4xi32>
      %c0_29 = arith.constant 0 : index
      %c0_30 = arith.constant 0 : index
      %54 = vector.load %arg7[%c0_29, %c0_30] : memref<8x4xi32, #tpu.memory_space<vmem>>, vector<8x4xi32>
      tpu.vector_store %arg7[%c0_29, %c0_30], %53 {strides = array<i32>} : memref<8x4xi32, #tpu.memory_space<vmem>>, vector<8x4xi32>,
    } else {
    }
    %c0 = arith.constant 0 : index
    %c0_1 = arith.constant 0 : index
    %3 = vector.load %arg2[%c0, %c0_1] : memref<8x32xf32, #tpu.memory_space<vmem>>, vector<8x32xf32>
    %4 = arith.truncf %3 : vector<8x32xf32> to vector<8x32xbf16>
    %c1_i32 = arith.constant 1 : i32
    %5 = arith.muli %arg0, %c1_i32 : i32
    %6 = arith.addi %5, %arg1 : i32
    %c1024_i32 = arith.constant 1024 : i32
    %7 = arith.muli %6, %c1024_i32 : i32
    %c0_i32_2 = arith.constant 0 : i32
    %8 = arith.index_cast %c0_i32_2 : i32 to index
    %c0_3 = arith.constant 0 : index
    %c0_4 = arith.constant 0 : index
    %9 = vector.load %arg3[%8, %c0_3, %c0_4] : memref<2x32x512xbf16, #tpu.memory_space<vmem>>, vector<1x32x512xbf16>
    %10 = vector.shape_cast %9 : vector<1x32x512xbf16> to vector<32x512xbf16>
    %cst = arith.constant dense<0.000000e+00> : vector<8x512xf32>
    %11 = tpu.matmul %4, %10, %cst {dimension_numbers = #tpu.dot_dimension_numbers<[1], [0], [0], [1], [0, 0, 1, 1], [], []>} : vector<8x32xbf16>, vector<32x512xbf16>, vector<8x512xf32> -> vector<8x512xf32>
    %c0_5 = arith.constant 0 : index
    %c0_6 = arith.constant 0 : index
    %12 = vector.load %arg6[%c0_5, %c0_6] : memref<8x4xf32, #tpu.memory_space<vmem>>, vector<8x4xf32>
    %13 = vector.extract_strided_slice %12 {offsets = [0, 3], sizes = [8, 1], strides = [1, 1]} : vector<8x4xf32> to vector<8x1xf32>
    %14 = vector.broadcast %13 : vector<8x1xf32> to vector<8x512xf32>
    %15 = arith.cmpf ogt, %11, %14 : vector<8x512xf32>
    %cst_7 = arith.constant 1.000000e+00 : f32
    %cst_8 = arith.constant 0.000000e+00 : f32
    %16 = vector.broadcast %cst_7 : f32 to vector<8x512xf32>
    %17 = vector.broadcast %cst_8 : f32 to vector<8x512xf32>
    %18 = arith.select %15, %16, %17 : vector<8x512xi1>, vector<8x512xf32>
    %19 = vector.shape_cast %18 : vector<8x512xf32> to vector<1x8x512xf32>
    %cst_9 = arith.constant dense<0xFF800000> : vector<1xf32>
    %20 = vector.multi_reduction <maximumf>, %19, %cst_9 [1, 2] : vector<1x8x512xf32> to vector<1xf32>
    %21 = vector.shape_cast %20 : vector<1xf32> to vector<1x1x1xf32>
    %22 = vector.extract %21[0, 0, 0] : f32 from vector<1x1x1xf32>
    %cst_10 = arith.constant 0.000000e+00 : f32
    %23 = arith.cmpf ogt, %22, %cst_10 : f32
    %24 = arith.extui %23 : i1 to i32
    %c0_i32_11 = arith.constant 0 : i32
    %25 = arith.cmpi ne, %24, %c0_i32_11 : i32
    scf.if %25 {
      %c512_i32 = arith.constant 512 : i32
      %47 = arith.muli %c0_i32_2, %c512_i32 : i32
      %48 = arith.addi %7, %47 : i32
      %49 = tpu.iota {dimensions = array<i32: 1>} : vector<8x512xi32>
      %50 = vector.broadcast %48 : i32 to vector<8x512xi32>
      %51 = arith.addi %50, %49 : vector<8x512xi32>
      %c1000_i32 = arith.constant 1000 : i32
      %52 = vector.broadcast %c1000_i32 : i32 to vector<8x512xi32>
      %53 = arith.cmpi slt, %51, %52 : vector<8x512xi32>
      %cst_25 = arith.constant 0xFF800000 : f32
      %54 = vector.broadcast %cst_25 : f32 to vector<8x512xf32>
      %55 = arith.select %53, %11, %54 : vector<8x512xi1>, vector<8x512xf32>
      %cst_26 = arith.constant dense<0xFF800000> : vector<8xf32>
      %56 = vector.multi_reduction <maximumf>, %55, %cst_26 [1] : vector<8x512xf32> to vector<8xf32>
      %57 = vector.shape_cast %56 : vector<8xf32> to vector<8x1xf32>
      %58 = vector.broadcast %57 : vector<8x1xf32> to vector<8x512xf32>
      %59 = arith.cmpf oeq, %55, %58 : vector<8x512xf32>
      %c1073741824_i32 = arith.constant 1073741824 : i32
      %60 = vector.broadcast %c1073741824_i32 : i32 to vector<8x512xi32>
      %61 = arith.select %59, %51, %60 : vector<8x512xi1>, vector<8x512xi32>
      %cst_27 = arith.constant dense<2147483647> : vector<8xi32>
      %62 = vector.multi_reduction <minsi>, %61, %cst_27 [1] : vector<8x512xi32> to vector<8xi32>
      %63 = vector.shape_cast %62 : vector<8xi32> to vector<8x1xi32>
      %64 = vector.broadcast %63 : vector<8x1xi32> to vector<8x512xi32>
      %65 = arith.cmpi eq, %51, %64 : vector<8x512xi32>
      %cst_28 = arith.constant 0xFF800000 : f32
      %66 = vector.broadcast %cst_28 : f32 to vector<8x512xf32>
      %67 = arith.select %65, %66, %55 : vector<8x512xi1>, vector<8x512xf32>
      %cst_29 = arith.constant dense<0xFF800000> : vector<8xf32>
      %68 = vector.multi_reduction <maximumf>, %67, %cst_29 [1] : vector<8x512xf32> to vector<8xf32>
      %69 = vector.shape_cast %68 : vector<8xf32> to vector<8x1xf32>
      %70 = vector.broadcast %69 : vector<8x1xf32> to vector<8x512xf32>
      %71 = arith.cmpf oeq, %67, %70 : vector<8x512xf32>
      %c1073741824_i32_30 = arith.constant 1073741824 : i32
      %72 = vector.broadcast %c1073741824_i32_30 : i32 to vector<8x512xi32>
      %73 = arith.select %71, %51, %72 : vector<8x512xi1>, vector<8x512xi32>
      %cst_31 = arith.constant dense<2147483647> : vector<8xi32>
      %74 = vector.multi_reduction <minsi>, %73, %cst_31 [1] : vector<8x512xi32> to vector<8xi32>
      %75 = vector.shape_cast %74 : vector<8xi32> to vector<8x1xi32>
      %76 = vector.broadcast %75 : vector<8x1xi32> to vector<8x512xi32>
      %77 = arith.cmpi eq, %51, %76 : vector<8x512xi32>
      %cst_32 = arith.constant 0xFF800000 : f32
      %78 = vector.broadcast %cst_32 : f32 to vector<8x512xf32>
      %79 = arith.select %77, %78, %67 : vector<8x512xi1>, vector<8x512xf32>
      %cst_33 = arith.constant dense<0xFF800000> : vector<8xf32>
      %80 = vector.multi_reduction <maximumf>, %79, %cst_33 [1] : vector<8x512xf32> to vector<8xf32>
      %81 = vector.shape_cast %80 : vector<8xf32> to vector<8x1xf32>
      %82 = vector.broadcast %81 : vector<8x1xf32> to vector<8x512xf32>
      %83 = arith.cmpf oeq, %79, %82 : vector<8x512xf32>
      %c1073741824_i32_34 = arith.constant 1073741824 : i32
      %84 = vector.broadcast %c1073741824_i32_34 : i32 to vector<8x512xi32>
      %85 = arith.select %83, %51, %84 : vector<8x512xi1>, vector<8x512xi32>
      %cst_35 = arith.constant dense<2147483647> : vector<8xi32>
      %86 = vector.multi_reduction <minsi>, %85, %cst_35 [1] : vector<8x512xi32> to vector<8xi32>
      %87 = vector.shape_cast %86 : vector<8xi32> to vector<8x1xi32>
      %88 = vector.broadcast %87 : vector<8x1xi32> to vector<8x512xi32>
      %89 = arith.cmpi eq, %51, %88 : vector<8x512xi32>
      %cst_36 = arith.constant 0xFF800000 : f32
      %90 = vector.broadcast %cst_36 : f32 to vector<8x512xf32>
      %91 = arith.select %89, %90, %79 : vector<8x512xi1>, vector<8x512xf32>
      %cst_37 = arith.constant dense<0xFF800000> : vector<8xf32>
      %92 = vector.multi_reduction <maximumf>, %91, %cst_37 [1] : vector<8x512xf32> to vector<8xf32>
      %93 = vector.shape_cast %92 : vector<8xf32> to vector<8x1xf32>
      %94 = vector.broadcast %93 : vector<8x1xf32> to vector<8x512xf32>
      %95 = arith.cmpf oeq, %91, %94 : vector<8x512xf32>
      %c1073741824_i32_38 = arith.constant 1073741824 : i32
      %96 = vector.broadcast %c1073741824_i32_38 : i32 to vector<8x512xi32>
      %97 = arith.select %95, %51, %96 : vector<8x512xi1>, vector<8x512xi32>
      %cst_39 = arith.constant dense<2147483647> : vector<8xi32>
      %98 = vector.multi_reduction <minsi>, %97, %cst_39 [1] : vector<8x512xi32> to vector<8xi32>
      %99 = vector.shape_cast %98 : vector<8xi32> to vector<8x1xi32>
      %100 = tpu.concatenate %57, %69, %81, %93 in 1 : vector<8x1xf32>, vector<8x1xf32>, vector<8x1xf32>, vector<8x1xf32> -> vector<8x4xf32>
      %101 = tpu.concatenate %63, %75, %87, %99 in 1 : vector<8x1xi32>, vector<8x1xi32>, vector<8x1xi32>, vector<8x1xi32> -> vector<8x4xi32>
      %c0_40 = arith.constant 0 : index
      %c0_41 = arith.constant 0 : index
      %102 = vector.load %arg6[%c0_40, %c0_41] : memref<8x4xf32, #tpu.memory_space<vmem>>, vector<8x4xf32>
      %103 = tpu.concatenate %102, %100 in 1 : vector<8x4xf32>, vector<8x4xf32> -> vector<8x8xf32>
      %c0_42 = arith.constant 0 : index
      %c0_43 = arith.constant 0 : index
      %104 = vector.load %arg7[%c0_42, %c0_43] : memref<8x4xi32, #tpu.memory_space<vmem>>, vector<8x4xi32>
      %105 = tpu.concatenate %104, %101 in 1 : vector<8x4xi32>, vector<8x4xi32> -> vector<8x8xi32>
      %cst_44 = arith.constant dense<0xFF800000> : vector<8xf32>
      %106 = vector.multi_reduction <maximumf>, %103, %cst_44 [1] : vector<8x8xf32> to vector<8xf32>
      %107 = vector.shape_cast %106 : vector<8xf32> to vector<8x1xf32>
      %108 = vector.broadcast %107 : vector<8x1xf32> to vector<8x8xf32>
      %109 = arith.cmpf oeq, %103, %108 : vector<8x8xf32>
      %c1073741824_i32_45 = arith.constant 1073741824 : i32
      %110 = vector.broadcast %c1073741824_i32_45 : i32 to vector<8x8xi32>
      %111 = arith.select %109, %105, %110 : vector<8x8xi1>, vector<8x8xi32>
      %cst_46 = arith.constant dense<2147483647> : vector<8xi32>
      %112 = vector.multi_reduction <minsi>, %111, %cst_46 [1] : vector<8x8xi32> to vector<8xi32>
      %113 = vector.shape_cast %112 : vector<8xi32> to vector<8x1xi32>
      %114 = vector.broadcast %113 : vector<8x1xi32> to vector<8x8xi32>
      %115 = arith.cmpi eq, %105, %114 : vector<8x8xi32>
      %cst_47 = arith.constant 0xFF800000 : f32
      %116 = vector.broadcast %cst_47 : f32 to vector<8x8xf32>
      %117 = arith.select %115, %116, %103 : vector<8x8xi1>, vector<8x8xf32>
      %cst_48 = arith.constant dense<0xFF800000> : vector<8xf32>
      %118 = vector.multi_reduction <maximumf>, %117, %cst_48 [1] : vector<8x8xf32> to vector<8xf32>
      %119 = vector.shape_cast %118 : vector<8xf32> to vector<8x1xf32>
      %120 = vector.broadcast %119 : vector<8x1xf32> to vector<8x8xf32>
      %121 = arith.cmpf oeq, %117, %120 : vector<8x8xf32>
      %c1073741824_i32_49 = arith.constant 1073741824 : i32
      %122 = vector.broadcast %c1073741824_i32_49 : i32 to vector<8x8xi32>
      %123 = arith.select %121, %105, %122 : vector<8x8xi1>, vector<8x8xi32>
      %cst_50 = arith.constant dense<2147483647> : vector<8xi32>
      %124 = vector.multi_reduction <minsi>, %123, %cst_50 [1] : vector<8x8xi32> to vector<8xi32>
      %125 = vector.shape_cast %124 : vector<8xi32> to vector<8x1xi32>
      %126 = vector.broadcast %125 : vector<8x1xi32> to vector<8x8xi32>
      %127 = arith.cmpi eq, %105, %126 : vector<8x8xi32>
      %cst_51 = arith.constant 0xFF800000 : f32
      %128 = vector.broadcast %cst_51 : f32 to vector<8x8xf32>
      %129 = arith.select %127, %128, %117 : vector<8x8xi1>, vector<8x8xf32>
      %cst_52 = arith.constant dense<0xFF800000> : vector<8xf32>
      %130 = vector.multi_reduction <maximumf>, %129, %cst_52 [1] : vector<8x8xf32> to vector<8xf32>
      %131 = vector.shape_cast %130 : vector<8xf32> to vector<8x1xf32>
      %132 = vector.broadcast %131 : vector<8x1xf32> to vector<8x8xf32>
      %133 = arith.cmpf oeq, %129, %132 : vector<8x8xf32>
      %c1073741824_i32_53 = arith.constant 1073741824 : i32
      %134 = vector.broadcast %c1073741824_i32_53 : i32 to vector<8x8xi32>
      %135 = arith.select %133, %105, %134 : vector<8x8xi1>, vector<8x8xi32>
      %cst_54 = arith.constant dense<2147483647> : vector<8xi32>
      %136 = vector.multi_reduction <minsi>, %135, %cst_54 [1] : vector<8x8xi32> to vector<8xi32>
      %137 = vector.shape_cast %136 : vector<8xi32> to vector<8x1xi32>
      %138 = vector.broadcast %137 : vector<8x1xi32> to vector<8x8xi32>
      %139 = arith.cmpi eq, %105, %138 : vector<8x8xi32>
      %cst_55 = arith.constant 0xFF800000 : f32
      %140 = vector.broadcast %cst_55 : f32 to vector<8x8xf32>
      %141 = arith.select %139, %140, %129 : vector<8x8xi1>, vector<8x8xf32>
      %cst_56 = arith.constant dense<0xFF800000> : vector<8xf32>
      %142 = vector.multi_reduction <maximumf>, %141, %cst_56 [1] : vector<8x8xf32> to vector<8xf32>
      %143 = vector.shape_cast %142 : vector<8xf32> to vector<8x1xf32>
      %144 = vector.broadcast %143 : vector<8x1xf32> to vector<8x8xf32>
      %145 = arith.cmpf oeq, %141, %144 : vector<8x8xf32>
      %c1073741824_i32_57 = arith.constant 1073741824 : i32
      %146 = vector.broadcast %c1073741824_i32_57 : i32 to vector<8x8xi32>
      %147 = arith.select %145, %105, %146 : vector<8x8xi1>, vector<8x8xi32>
      %cst_58 = arith.constant dense<2147483647> : vector<8xi32>
      %148 = vector.multi_reduction <minsi>, %147, %cst_58 [1] : vector<8x8xi32> to vector<8xi32>
      %149 = vector.shape_cast %148 : vector<8xi32> to vector<8x1xi32>
      %150 = tpu.concatenate %107, %119, %131, %143 in 1 : vector<8x1xf32>, vector<8x1xf32>, vector<8x1xf32>, vector<8x1xf32> -> vector<8x4xf32>
      %151 = tpu.concatenate %113, %125, %137, %149 in 1 : vector<8x1xi32>, vector<8x1xi32>, vector<8x1xi32>, vector<8x1xi32> -> vector<8x4xi32>
      %c0_59 = arith.constant 0 : index
      %c0_60 = arith.constant 0 : index
      %152 = vector.load %arg6[%c0_59, %c0_60] : memref<8x4xf32, #tpu.memory_space<vmem>>, vector<8x4xf32>
      tpu.vector_store %arg6[%c0_59, %c0_60], %150 {strides = array<i32>} : memref<8x4xf32, #tpu.memory_space<vmem>>, vector<8x4xf32>,
      %c0_61 = arith.constant 0 : index
      %c0_62 = arith.constant 0 : index
      %153 = vector.load %arg7[%c0_61, %c0_62] : memref<8x4xi32, #tpu.memory_space<vmem>>, vector<8x4xi32>
      tpu.vector_store %arg7[%c0_61, %c0_62], %151 {strides = array<i32>} : memref<8x4xi32, #tpu.memory_space<vmem>>, vector<8x4xi32>,
    } else {
    }
    %c1_i32_12 = arith.constant 1 : i32
    %26 = arith.index_cast %c1_i32_12 : i32 to index
    %c0_13 = arith.constant 0 : index
    %c0_14 = arith.constant 0 : index
    %27 = vector.load %arg3[%26, %c0_13, %c0_14] : memref<2x32x512xbf16, #tpu.memory_space<vmem>>, vector<1x32x512xbf16>
    %28 = vector.shape_cast %27 : vector<1x32x512xbf16> to vector<32x512xbf16>
    %cst_15 = arith.constant dense<0.000000e+00> : vector<8x512xf32>
    %29 = tpu.matmul %4, %28, %cst_15 {dimension_numbers = #tpu.dot_dimension_numbers<[1], [0], [0], [1], [0, 0, 1, 1], [], []>} : vector<8x32xbf16>, vector<32x512xbf16>, vector<8x512xf32> -> vector<8x512xf32>
    %c0_16 = arith.constant 0 : index
    %c0_17 = arith.constant 0 : index
    %30 = vector.load %arg6[%c0_16, %c0_17] : memref<8x4xf32, #tpu.memory_space<vmem>>, vector<8x4xf32>
    %31 = vector.extract_strided_slice %30 {offsets = [0, 3], sizes = [8, 1], strides = [1, 1]} : vector<8x4xf32> to vector<8x1xf32>
    %32 = vector.broadcast %31 : vector<8x1xf32> to vector<8x512xf32>
    %33 = arith.cmpf ogt, %29, %32 : vector<8x512xf32>
    %cst_18 = arith.constant 1.000000e+00 : f32
    %cst_19 = arith.constant 0.000000e+00 : f32
    %34 = vector.broadcast %cst_18 : f32 to vector<8x512xf32>
    %35 = vector.broadcast %cst_19 : f32 to vector<8x512xf32>
    %36 = arith.select %33, %34, %35 : vector<8x512xi1>, vector<8x512xf32>
    %37 = vector.shape_cast %36 : vector<8x512xf32> to vector<1x8x512xf32>
    %cst_20 = arith.constant dense<0xFF800000> : vector<1xf32>
    %38 = vector.multi_reduction <maximumf>, %37, %cst_20 [1, 2] : vector<1x8x512xf32> to vector<1xf32>
    %39 = vector.shape_cast %38 : vector<1xf32> to vector<1x1x1xf32>
    %40 = vector.extract %39[0, 0, 0] : f32 from vector<1x1x1xf32>
    %cst_21 = arith.constant 0.000000e+00 : f32
    %41 = arith.cmpf ogt, %40, %cst_21 : f32
    %42 = arith.extui %41 : i1 to i32
    %c0_i32_22 = arith.constant 0 : i32
    %43 = arith.cmpi ne, %42, %c0_i32_22 : i32
    scf.if %43 {
      %c512_i32 = arith.constant 512 : i32
      %47 = arith.muli %c1_i32_12, %c512_i32 : i32
      %48 = arith.addi %7, %47 : i32
      %49 = tpu.iota {dimensions = array<i32: 1>} : vector<8x512xi32>
      %50 = vector.broadcast %48 : i32 to vector<8x512xi32>
      %51 = arith.addi %50, %49 : vector<8x512xi32>
      %c1000_i32 = arith.constant 1000 : i32
      %52 = vector.broadcast %c1000_i32 : i32 to vector<8x512xi32>
      %53 = arith.cmpi slt, %51, %52 : vector<8x512xi32>
      %cst_25 = arith.constant 0xFF800000 : f32
      %54 = vector.broadcast %cst_25 : f32 to vector<8x512xf32>
      %55 = arith.select %53, %29, %54 : vector<8x512xi1>, vector<8x512xf32>
      %cst_26 = arith.constant dense<0xFF800000> : vector<8xf32>
      %56 = vector.multi_reduction <maximumf>, %55, %cst_26 [1] : vector<8x512xf32> to vector<8xf32>
      %57 = vector.shape_cast %56 : vector<8xf32> to vector<8x1xf32>
      %58 = vector.broadcast %57 : vector<8x1xf32> to vector<8x512xf32>
      %59 = arith.cmpf oeq, %55, %58 : vector<8x512xf32>
      %c1073741824_i32 = arith.constant 1073741824 : i32
      %60 = vector.broadcast %c1073741824_i32 : i32 to vector<8x512xi32>
      %61 = arith.select %59, %51, %60 : vector<8x512xi1>, vector<8x512xi32>
      %cst_27 = arith.constant dense<2147483647> : vector<8xi32>
      %62 = vector.multi_reduction <minsi>, %61, %cst_27 [1] : vector<8x512xi32> to vector<8xi32>
      %63 = vector.shape_cast %62 : vector<8xi32> to vector<8x1xi32>
      %64 = vector.broadcast %63 : vector<8x1xi32> to vector<8x512xi32>
      %65 = arith.cmpi eq, %51, %64 : vector<8x512xi32>
      %cst_28 = arith.constant 0xFF800000 : f32
      %66 = vector.broadcast %cst_28 : f32 to vector<8x512xf32>
      %67 = arith.select %65, %66, %55 : vector<8x512xi1>, vector<8x512xf32>
      %cst_29 = arith.constant dense<0xFF800000> : vector<8xf32>
      %68 = vector.multi_reduction <maximumf>, %67, %cst_29 [1] : vector<8x512xf32> to vector<8xf32>
      %69 = vector.shape_cast %68 : vector<8xf32> to vector<8x1xf32>
      %70 = vector.broadcast %69 : vector<8x1xf32> to vector<8x512xf32>
      %71 = arith.cmpf oeq, %67, %70 : vector<8x512xf32>
      %c1073741824_i32_30 = arith.constant 1073741824 : i32
      %72 = vector.broadcast %c1073741824_i32_30 : i32 to vector<8x512xi32>
      %73 = arith.select %71, %51, %72 : vector<8x512xi1>, vector<8x512xi32>
      %cst_31 = arith.constant dense<2147483647> : vector<8xi32>
      %74 = vector.multi_reduction <minsi>, %73, %cst_31 [1] : vector<8x512xi32> to vector<8xi32>
      %75 = vector.shape_cast %74 : vector<8xi32> to vector<8x1xi32>
      %76 = vector.broadcast %75 : vector<8x1xi32> to vector<8x512xi32>
      %77 = arith.cmpi eq, %51, %76 : vector<8x512xi32>
      %cst_32 = arith.constant 0xFF800000 : f32
      %78 = vector.broadcast %cst_32 : f32 to vector<8x512xf32>
      %79 = arith.select %77, %78, %67 : vector<8x512xi1>, vector<8x512xf32>
      %cst_33 = arith.constant dense<0xFF800000> : vector<8xf32>
      %80 = vector.multi_reduction <maximumf>, %79, %cst_33 [1] : vector<8x512xf32> to vector<8xf32>
      %81 = vector.shape_cast %80 : vector<8xf32> to vector<8x1xf32>
      %82 = vector.broadcast %81 : vector<8x1xf32> to vector<8x512xf32>
      %83 = arith.cmpf oeq, %79, %82 : vector<8x512xf32>
      %c1073741824_i32_34 = arith.constant 1073741824 : i32
      %84 = vector.broadcast %c1073741824_i32_34 : i32 to vector<8x512xi32>
      %85 = arith.select %83, %51, %84 : vector<8x512xi1>, vector<8x512xi32>
      %cst_35 = arith.constant dense<2147483647> : vector<8xi32>
      %86 = vector.multi_reduction <minsi>, %85, %cst_35 [1] : vector<8x512xi32> to vector<8xi32>
      %87 = vector.shape_cast %86 : vector<8xi32> to vector<8x1xi32>
      %88 = vector.broadcast %87 : vector<8x1xi32> to vector<8x512xi32>
      %89 = arith.cmpi eq, %51, %88 : vector<8x512xi32>
      %cst_36 = arith.constant 0xFF800000 : f32
      %90 = vector.broadcast %cst_36 : f32 to vector<8x512xf32>
      %91 = arith.select %89, %90, %79 : vector<8x512xi1>, vector<8x512xf32>
      %cst_37 = arith.constant dense<0xFF800000> : vector<8xf32>
      %92 = vector.multi_reduction <maximumf>, %91, %cst_37 [1] : vector<8x512xf32> to vector<8xf32>
      %93 = vector.shape_cast %92 : vector<8xf32> to vector<8x1xf32>
      %94 = vector.broadcast %93 : vector<8x1xf32> to vector<8x512xf32>
      %95 = arith.cmpf oeq, %91, %94 : vector<8x512xf32>
      %c1073741824_i32_38 = arith.constant 1073741824 : i32
      %96 = vector.broadcast %c1073741824_i32_38 : i32 to vector<8x512xi32>
      %97 = arith.select %95, %51, %96 : vector<8x512xi1>, vector<8x512xi32>
      %cst_39 = arith.constant dense<2147483647> : vector<8xi32>
      %98 = vector.multi_reduction <minsi>, %97, %cst_39 [1] : vector<8x512xi32> to vector<8xi32>
      %99 = vector.shape_cast %98 : vector<8xi32> to vector<8x1xi32>
      %100 = tpu.concatenate %57, %69, %81, %93 in 1 : vector<8x1xf32>, vector<8x1xf32>, vector<8x1xf32>, vector<8x1xf32> -> vector<8x4xf32>
      %101 = tpu.concatenate %63, %75, %87, %99 in 1 : vector<8x1xi32>, vector<8x1xi32>, vector<8x1xi32>, vector<8x1xi32> -> vector<8x4xi32>
      %c0_40 = arith.constant 0 : index
      %c0_41 = arith.constant 0 : index
      %102 = vector.load %arg6[%c0_40, %c0_41] : memref<8x4xf32, #tpu.memory_space<vmem>>, vector<8x4xf32>
      %103 = tpu.concatenate %102, %100 in 1 : vector<8x4xf32>, vector<8x4xf32> -> vector<8x8xf32>
      %c0_42 = arith.constant 0 : index
      %c0_43 = arith.constant 0 : index
      %104 = vector.load %arg7[%c0_42, %c0_43] : memref<8x4xi32, #tpu.memory_space<vmem>>, vector<8x4xi32>
      %105 = tpu.concatenate %104, %101 in 1 : vector<8x4xi32>, vector<8x4xi32> -> vector<8x8xi32>
      %cst_44 = arith.constant dense<0xFF800000> : vector<8xf32>
      %106 = vector.multi_reduction <maximumf>, %103, %cst_44 [1] : vector<8x8xf32> to vector<8xf32>
      %107 = vector.shape_cast %106 : vector<8xf32> to vector<8x1xf32>
      %108 = vector.broadcast %107 : vector<8x1xf32> to vector<8x8xf32>
      %109 = arith.cmpf oeq, %103, %108 : vector<8x8xf32>
      %c1073741824_i32_45 = arith.constant 1073741824 : i32
      %110 = vector.broadcast %c1073741824_i32_45 : i32 to vector<8x8xi32>
      %111 = arith.select %109, %105, %110 : vector<8x8xi1>, vector<8x8xi32>
      %cst_46 = arith.constant dense<2147483647> : vector<8xi32>
      %112 = vector.multi_reduction <minsi>, %111, %cst_46 [1] : vector<8x8xi32> to vector<8xi32>
      %113 = vector.shape_cast %112 : vector<8xi32> to vector<8x1xi32>
      %114 = vector.broadcast %113 : vector<8x1xi32> to vector<8x8xi32>
      %115 = arith.cmpi eq, %105, %114 : vector<8x8xi32>
      %cst_47 = arith.constant 0xFF800000 : f32
      %116 = vector.broadcast %cst_47 : f32 to vector<8x8xf32>
      %117 = arith.select %115, %116, %103 : vector<8x8xi1>, vector<8x8xf32>
      %cst_48 = arith.constant dense<0xFF800000> : vector<8xf32>
      %118 = vector.multi_reduction <maximumf>, %117, %cst_48 [1] : vector<8x8xf32> to vector<8xf32>
      %119 = vector.shape_cast %118 : vector<8xf32> to vector<8x1xf32>
      %120 = vector.broadcast %119 : vector<8x1xf32> to vector<8x8xf32>
      %121 = arith.cmpf oeq, %117, %120 : vector<8x8xf32>
      %c1073741824_i32_49 = arith.constant 1073741824 : i32
      %122 = vector.broadcast %c1073741824_i32_49 : i32 to vector<8x8xi32>
      %123 = arith.select %121, %105, %122 : vector<8x8xi1>, vector<8x8xi32>
      %cst_50 = arith.constant dense<2147483647> : vector<8xi32>
      %124 = vector.multi_reduction <minsi>, %123, %cst_50 [1] : vector<8x8xi32> to vector<8xi32>
      %125 = vector.shape_cast %124 : vector<8xi32> to vector<8x1xi32>
      %126 = vector.broadcast %125 : vector<8x1xi32> to vector<8x8xi32>
      %127 = arith.cmpi eq, %105, %126 : vector<8x8xi32>
      %cst_51 = arith.constant 0xFF800000 : f32
      %128 = vector.broadcast %cst_51 : f32 to vector<8x8xf32>
      %129 = arith.select %127, %128, %117 : vector<8x8xi1>, vector<8x8xf32>
      %cst_52 = arith.constant dense<0xFF800000> : vector<8xf32>
      %130 = vector.multi_reduction <maximumf>, %129, %cst_52 [1] : vector<8x8xf32> to vector<8xf32>
      %131 = vector.shape_cast %130 : vector<8xf32> to vector<8x1xf32>
      %132 = vector.broadcast %131 : vector<8x1xf32> to vector<8x8xf32>
      %133 = arith.cmpf oeq, %129, %132 : vector<8x8xf32>
      %c1073741824_i32_53 = arith.constant 1073741824 : i32
      %134 = vector.broadcast %c1073741824_i32_53 : i32 to vector<8x8xi32>
      %135 = arith.select %133, %105, %134 : vector<8x8xi1>, vector<8x8xi32>
      %cst_54 = arith.constant dense<2147483647> : vector<8xi32>
      %136 = vector.multi_reduction <minsi>, %135, %cst_54 [1] : vector<8x8xi32> to vector<8xi32>
      %137 = vector.shape_cast %136 : vector<8xi32> to vector<8x1xi32>
      %138 = vector.broadcast %137 : vector<8x1xi32> to vector<8x8xi32>
      %139 = arith.cmpi eq, %105, %138 : vector<8x8xi32>
      %cst_55 = arith.constant 0xFF800000 : f32
      %140 = vector.broadcast %cst_55 : f32 to vector<8x8xf32>
      %141 = arith.select %139, %140, %129 : vector<8x8xi1>, vector<8x8xf32>
      %cst_56 = arith.constant dense<0xFF800000> : vector<8xf32>
      %142 = vector.multi_reduction <maximumf>, %141, %cst_56 [1] : vector<8x8xf32> to vector<8xf32>
      %143 = vector.shape_cast %142 : vector<8xf32> to vector<8x1xf32>
      %144 = vector.broadcast %143 : vector<8x1xf32> to vector<8x8xf32>
      %145 = arith.cmpf oeq, %141, %144 : vector<8x8xf32>
      %c1073741824_i32_57 = arith.constant 1073741824 : i32
      %146 = vector.broadcast %c1073741824_i32_57 : i32 to vector<8x8xi32>
      %147 = arith.select %145, %105, %146 : vector<8x8xi1>, vector<8x8xi32>
      %cst_58 = arith.constant dense<2147483647> : vector<8xi32>
      %148 = vector.multi_reduction <minsi>, %147, %cst_58 [1] : vector<8x8xi32> to vector<8xi32>
      %149 = vector.shape_cast %148 : vector<8xi32> to vector<8x1xi32>
      %150 = tpu.concatenate %107, %119, %131, %143 in 1 : vector<8x1xf32>, vector<8x1xf32>, vector<8x1xf32>, vector<8x1xf32> -> vector<8x4xf32>
      %151 = tpu.concatenate %113, %125, %137, %149 in 1 : vector<8x1xi32>, vector<8x1xi32>, vector<8x1xi32>, vector<8x1xi32> -> vector<8x4xi32>
      %c0_59 = arith.constant 0 : index
      %c0_60 = arith.constant 0 : index
      %152 = vector.load %arg6[%c0_59, %c0_60] : memref<8x4xf32, #tpu.memory_space<vmem>>, vector<8x4xf32>
      tpu.vector_store %arg6[%c0_59, %c0_60], %150 {strides = array<i32>} : memref<8x4xf32, #tpu.memory_space<vmem>>, vector<8x4xf32>,
      %c0_61 = arith.constant 0 : index
      %c0_62 = arith.constant 0 : index
      %153 = vector.load %arg7[%c0_61, %c0_62] : memref<8x4xi32, #tpu.memory_space<vmem>>, vector<8x4xi32>
      tpu.vector_store %arg7[%c0_61, %c0_62], %151 {strides = array<i32>} : memref<8x4xi32, #tpu.memory_space<vmem>>, vector<8x4xi32>,
    } else {
    }
    %c2_i32 = arith.constant 2 : i32
    %c0_i32_23 = arith.constant 0 : i32
    %44 = arith.cmpi eq, %arg1, %c0_i32_23 : i32
    %45 = arith.extui %44 : i1 to i32
    %c0_i32_24 = arith.constant 0 : i32
    %46 = arith.cmpi ne, %45, %c0_i32_24 : i32
    scf.if %46 {
      %c0_25 = arith.constant 0 : index
      %c0_26 = arith.constant 0 : index
      %47 = vector.load %arg6[%c0_25, %c0_26] : memref<8x4xf32, #tpu.memory_space<vmem>>, vector<8x4xf32>
      %c0_27 = arith.constant 0 : index
      %c0_28 = arith.constant 0 : index
      %c0_29 = arith.constant 0 : index
      %48 = vector.load %arg4[%c0_27, %c0_28, %c0_29] : memref<1x8x4xf32, #tpu.memory_space<vmem>>, vector<1x8x4xf32>
      %49 = vector.shape_cast %48 : vector<1x8x4xf32> to vector<8x4xf32>
      %50 = vector.shape_cast %47 : vector<8x4xf32> to vector<1x8x4xf32>
      tpu.vector_store %arg4[%c0_27, %c0_28, %c0_29], %50 {strides = array<i32>} : memref<1x8x4xf32, #tpu.memory_space<vmem>>, vector<1x8x4xf32>,
      %c0_30 = arith.constant 0 : index
      %c0_31 = arith.constant 0 : index
      %51 = vector.load %arg7[%c0_30, %c0_31] : memref<8x4xi32, #tpu.memory_space<vmem>>, vector<8x4xi32>
      %c0_32 = arith.constant 0 : index
      %c0_33 = arith.constant 0 : index
      %c0_34 = arith.constant 0 : index
      %52 = vector.load %arg5[%c0_32, %c0_33, %c0_34] : memref<1x8x4xi32, #tpu.memory_space<vmem>>, vector<1x8x4xi32>
      %53 = vector.shape_cast %52 : vector<1x8x4xi32> to vector<8x4xi32>
      %54 = vector.shape_cast %51 : vector<8x4xi32> to vector<1x8x4xi32>
      tpu.vector_store %arg5[%c0_32, %c0_33, %c0_34], %54 {strides = array<i32>} : memref<1x8x4xi32, #tpu.memory_space<vmem>>, vector<1x8x4xi32>,
    } else {
    }
    return
  }
  func.func @transform_0(%arg0: i32, %arg1: i32) -> (i32, i32) {
    %c0_i32 = arith.constant 0 : i32
    %c0_i32_0 = arith.constant 0 : i32
    %c0_i32_1 = arith.constant 0 : i32
    return %c0_i32, %c0_i32_0 : i32, i32
  }
  func.func @transform_1(%arg0: i32, %arg1: i32) -> (i32, i32, i32) {
    %c1_i32 = arith.constant 1 : i32
    %0 = arith.muli %arg0, %c1_i32 : i32
    %1 = arith.addi %0, %arg1 : i32
    %c0_i32 = arith.constant 0 : i32
    %c0_i32_0 = arith.constant 0 : i32
    %c0_i32_1 = arith.constant 0 : i32
    return %1, %c0_i32, %c0_i32_0 : i32, i32, i32
  }
  func.func @transform_2(%arg0: i32, %arg1: i32) -> (i32, i32, i32) {
    %c0_i32 = arith.constant 0 : i32
    %c0_i32_0 = arith.constant 0 : i32
    %c0_i32_1 = arith.constant 0 : i32
    return %arg0, %c0_i32, %c0_i32_0 : i32, i32, i32
  }
  func.func @transform_3(%arg0: i32, %arg1: i32) -> (i32, i32, i32) {
    %c0_i32 = arith.constant 0 : i32
    %c0_i32_0 = arith.constant 0 : i32
    %c0_i32_1 = arith.constant 0 : i32
    return %arg0, %c0_i32, %c0_i32_0 : i32, i32, i32
  }
}

</mosaic_0001>

<bundles_post_ra>
// kernel: _retrieve.1
= control target key start
LH: loop header
LB: loop body
LE: loop exit
PB: predicated region body
PF: predicated region fallthrough
CT: control target
= control target key end

     0   :  { %9 = vsyncpa [#allocation5], 0  ;;  %s1043_s15 = smov [#allocation4]   ;;  %s1044_s17 = smov 256   ;;  %s1358_s0 = inlined_call_operand.vmem [shape: f32[8,32], index: 0, kind: input, shape index: {}]   ;;  %s1359_s1 = inlined_call_operand.hbm [shape: bf16[2,32,512], index: 1, kind: input, shape index: {}]   ;;  %s1360_s2 = inlined_call_operand.vmem [shape: f32[1,8,4], index: 2, kind: output, shape index: {0}]   ;;  %s1361_s3 = inlined_call_operand.vmem [shape: s32[1,8,4], index: 3, kind: output, shape index: {1}]  }
   0x1   :  { %s21_s14 = sshll.u32 %s1359_s1, 4  ;;  %s23_s16 = sshll.u32 %s1043_s15, 4  ;;  %s22_s14 = int_to_ptr.hbm [resolvable:$true] %s21_s14  ;;  %s24_s16 = int_to_ptr.vmem [resolvable:$true] %s23_s16 }
   0x2   :  { %s1045_s18 = smov 16  }
   0x3   :  { %29 = dma.hbm_to_vmem [thread:$0]  %s22_s14, 2048, %s24_s16, [#allocation5], %s1044_s17, %s1044_s17, %s1045_s18  }
   0x4   :  { %1041 = dma.done.wait [#allocation5], 2048  }
   0x5   :  { %1042 = vsyncadd [#allocation5], 4294965248  ;;  %vm41_vm0 = vcmask 31744   ;;  %v1046_v0 = vmov 3   ;;  %v1047_v1 = vmov -inf   ;;  %v45_v2 = vlaneseq  ;;  %v50_v28 = vld [vmem:[%s1358_s0] sm:$0xff] }
   0x6   :  { %1015 = vset.pattern.permute.xlu0 %v1046_v0  ;;  %42 = vst.msk [vmem:[#allocation2] sm:$0xff] %vm41_vm0, %v1047_v1  ;;  %v933_v5 = vld [vmem:[#allocation4 + $0x20] sm:$0xf]  ;;  %v993_v6 = vld [vmem:[#allocation4 + $0x2c] sm:$0xf0]  ;;  %v1083_v31 = vpack.c.bf16 %v50_v28, %v50_v28  ;;  %vm102_vm1 = vcmask 261120  }
   0x7   :  { %v1076_v3 = vand.u32 127, %v45_v2  ;;  %v991_v7 = vld [vmem:[#allocation4 + $0x24] sm:$0xf]  ;;  %v934_v8 = vor.u32 %v993_v6, %v933_v5  ;;  %v935_v9 = vld [vmem:[#allocation4 + $0x30] sm:$0xf0]  ;;  %v1048_v35 = vmov 0.0  }
   0x8   :  { %v941_v10 = vld [vmem:[#allocation4 + $0x28] sm:$0xf]  ;;  %v994_v11 = vld [vmem:[#allocation4 + $0x34] sm:$0xf0]  ;;  %v938_v12 = vor.u32 %v991_v7, %v935_v9  ;;  %v992_v14 = vld [vmem:[#allocation4 + $0x2c] sm:$0xf] }
   0x9   :  { %v48_v4 = vadd.s32 1024, %v1076_v3  ;;  %v942_v13 = vor.u32 %v994_v11, %v941_v10  ;;  %v943_v15 = vld [vmem:[#allocation4 + $0x38] sm:$0xf0]  ;;  %v917_v16 = vld [vmem:[#allocation4] sm:$0xf]  ;;  %112 = vmatpush.bf16.msra.mxu0 %v934_v8 }
   0xa   :  { %v946_v17 = vor.u32 %v992_v14, %v943_v15  ;;  %v989_v18 = vld [vmem:[#allocation4 + $0xc] sm:$0xf0]  ;;  %v987_v19 = vld [vmem:[#allocation4 + $0x4] sm:$0xf]  ;;  %v919_v20 = vld [vmem:[#allocation4 + $0x10] sm:$0xf0]  ;;  %125 = vmatpush.bf16.msra.mxu1 %v938_v12 }
   0xb   :  { %138 = vmatpush.bf16.msra.mxu2 %v942_v13  ;;  %v918_v21 = vor.u32 %v989_v18, %v917_v16  ;;  %v922_v22 = vor.u32 %v987_v19, %v919_v20  ;;  %v925_v23 = vld [vmem:[#allocation4 + $0x8] sm:$0xf]  ;;  %v990_v24 = vld [vmem:[#allocation4 + $0x14] sm:$0xf0]  ;;  %v988_v25 = vld [vmem:[#allocation4 + $0xc] sm:$0xf] }
   0xc   :  { %151 = vmatpush.bf16.msra.mxu3 %v946_v17  ;;  %v926_v26 = vor.u32 %v990_v24, %v925_v23  ;;  %v927_v27 = vld [vmem:[#allocation4 + $0x18] sm:$0xf0]  ;;  %49 = vst.msk [vmem:[#allocation3] sm:$0xff] %vm41_vm0, %v48_v4 }
   0xd   :  { %v158_v29 = vld [vmem:[#allocation2] sm:$0xff]  ;;  %v930_v30 = vor.u32 %v988_v25, %v927_v27  ;;  %113 = vmatpush.bf16.msra.mxu0 %v918_v21 }
   0xe   :  { %161 = vperm.xlu0 %1015, %v158_v29   ;;  %126 = vmatpush.bf16.msra.mxu1 %v922_v22 }
   0xf   :  { %139 = vmatpush.bf16.msra.mxu2 %v926_v26 }
  0x10   :  { %152 = vmatpush.bf16.msra.mxu3 %v930_v30  ;;  %947 = vmatmul.msk.bf16.vlgmr.msra.gmra.mxu0 %vm102_vm1, %v1083_v31 }
  0x11   :  { %948 = vmatmul.msk.bf16.vlgmr.msra.gmra.mxu1 %vm102_vm1, %v1083_v31 }
  0x12   :  { %949 = vmatmul.msk.bf16.vlgmr.msra.gmra.mxu2 %vm102_vm1, %v1083_v31 }
  0x13   :  { %950 = vmatmul.msk.bf16.vlgmr.msra.gmra.mxu3 %vm102_vm1, %v1083_v31 }
  0x80   :  { %v162_v33 = vpop.permute.xlu0 %161 }
  0x8d   :  { %v1093_v32 = vpop.f32.mrf.mxu0 }
  0x8e   :  { %v1095_v34 = vpop.f32.mrf.mxu1  ;;  %vm164_vm2 = vcmp.gt.f32.partialorder %v1093_v32, %v162_v33 }
  0x8f   :  { %vm165_vm3 = vcmp.gt.f32.partialorder %v1095_v34, %v162_v33  ;;  %v168_v36 = vsel %vm164_vm2, 1.0, %v1048_v35 }
  0x90   :  { %v169_v37 = vsel %vm165_vm3, 1.0, %v1048_v35 }
  0x91   :  { %v172_v43 = vmax.f32 %v168_v36, %v169_v37 }
  0x95   :  { %v1101_v38 = vpop.f32.mrf.mxu2  ;;  %v117_v40 = vpop.f32.mrf.mxu0 }
  0x96   :  { %v1103_v39 = vpop.f32.mrf.mxu3  ;;  %vm166_vm4 = vcmp.gt.f32.partialorder %v1101_v38, %v162_v33  ;;  %v130_v41 = vpop.f32.mrf.mxu1 }
  0x97   :  { %vm167_vm5 = vcmp.gt.f32.partialorder %v1103_v39, %v162_v33  ;;  %v170_v42 = vsel %vm166_vm4, 1.0, %v1048_v35 }
  0x98   :  { %v171_v44 = vsel %vm167_vm5, 1.0, %v1048_v35 }
  0x99   :  { %v173_v45 = vmax.f32 %v170_v42, %v171_v44 }
  0x9b   :  { %v174_v46 = vmax.f32 %v172_v43, %v173_v45 }
  0x9d   :  { %175 = vmax.xlane.f32.xlu0 %v174_v46  ;;  %v143_v47 = vpop.f32.mrf.mxu2 }
  0x9e   :  { %v156_v48 = vpop.f32.mrf.mxu3 }
 0x110   :  { %v176_v49 = vpop.xlane.xlu0 %175 }
 0x111   :  { %v177_v50 = vrot.slane %v176_v49, 4 }
 0x113   :  { %v178_v51 = vmax.f32 %v176_v49, %v177_v50 }
 0x115   :  { %v179_v52 = vrot.slane %v178_v51, 2 }
 0x117   :  { %v180_v53 = vmax.f32 %v178_v51, %v179_v52 }
 0x119   :  { %v181_v54 = vrot.slane %v180_v53, 1 }
 0x11b   :  { %v182_v55 = vmax.f32 %v180_v53, %v181_v54 }
 0x11d   :  { %1003 = vpush %v182_v55 }
 0x14e   :  { %s1004_s0 = spop %1003 }
 0x14f   :  { %p184_p0 = scmp.gt.f32.partialorder %s1004_s0, 0.0 }
 0x150   :  { %v206_v56 = vmax.f32 (%p184_p0), %v1093_v32, %v1095_v34  ;;  %v207_v57 = vmax.f32 (%p184_p0), %v1101_v38, %v1103_v39  ;;  %v1114_v59 = vadd.s32 (%p184_p0), 128, %v1076_v3  ;;  %v1117_v60 = vadd.s32 (%p184_p0), 256, %v1076_v3  ;;  %s1049_s20 = smov (%p184_p0), 4  }
 0x151   :  { %187 = sbr.rel (!%p184_p0) target bundleno = 3246 (0xcae), region = 21  ;;  %v1120_v61 = vadd.s32 (%p184_p0), 384, %v1076_v3 }
 0x152   :  { %v208_v58 = vmax.f32 (%p184_p0), %v206_v56, %v207_v57 }
 0x154   :  { %209 = vmax.xlane.f32.xlu0 (%p184_p0), %v208_v58 }
 0x1c7   :  { %v1122_v62 = vpop.xlane.xlu0 %209 }
 0x1c8   :  { %vm211_vm6 = vcmp.eq.f32.partialorder %v1093_v32, %v1122_v62  ;;  %vm212_vm7 = vcmp.eq.f32.partialorder %v1095_v34, %v1122_v62  ;;  %vm213_vm8 = vcmp.eq.f32.partialorder %v1101_v38, %v1122_v62  ;;  %vm214_vm9 = vcmp.eq.f32.partialorder %v1103_v39, %v1122_v62 }
 0x1c9   :  { %v215_v63 = vsel %vm211_vm6, %v1076_v3, 1073741824  ;;  %v216_v1 = vsel %vm212_vm7, %v1114_v59, 1073741824  ;;  %v217_v2 = vsel %vm213_vm8, %v1117_v60, 1073741824  ;;  %v218_v4 = vsel %vm214_vm9, %v1120_v61, 1073741824 }
 0x1ca   :  { %vm219_vm10 = vcmp.lt.s32.totalorder %v215_v63, %v216_v1  ;;  %vm221_vm11 = vcmp.lt.s32.totalorder %v217_v2, %v218_v4 }
 0x1cb   :  { %v220_v5 = vsel %vm219_vm10, %v215_v63, %v216_v1  ;;  %v222_v6 = vsel %vm221_vm11, %v217_v2, %v218_v4 }
 0x1cc   :  { %vm223_vm12 = vcmp.lt.s32.totalorder %v220_v5, %v222_v6 }
 0x1cd   :  { %v224_v7 = vsel %vm223_vm12, %v220_v5, %v222_v6 }
 0x1ce   :  { %v226_v8 = vshra.s32 %v224_v7, 16  ;;  %v225_v10 = vand.u32 65535, %v224_v7 }
 0x1d0   :  { %v228_v9 = vcvt.s32.f32 %v226_v8  ;;  %v227_v12 = vcvt.s32.f32 %v225_v10 }
 0x1d2   :  { %229 = vmin.xlane.f32.xlu0 %v228_v9 }
 0x245   :  { %v230_v11 = vpop.xlane.xlu0 %229 }
 0x246   :  { %vm231_vm13 = vcmp.eq.f32.partialorder %v228_v9, %v230_v11  ;;  %v236_v14 = vcvt.f32.s32 %v230_v11 }
 0x247   :  { %v232_v13 = vsel %vm231_vm13, %v227_v12, inf }
 0x248   :  { %233 = vmin.xlane.f32.xlu1 %v232_v13  ;;  %v237_v16 = vshll.u32 %v236_v14, 16 }
 0x2bb   :  { %v234_v15 = vpop.xlane.xlu1 %233 }
 0x2bc   :  { %v235_v17 = vcvt.f32.s32 %v234_v15 }
 0x2be   :  { %v1136_v18 = vadd.s32 %v237_v16, %v235_v17 }
 0x2c0   :  { %vm239_vm14 = vcmp.eq.s32.totalorder %v1076_v3, %v1136_v18  ;;  %vm240_vm15 = vcmp.eq.s32.totalorder %v1114_v59, %v1136_v18  ;;  %vm241_vm2 = vcmp.eq.s32.totalorder %v1117_v60, %v1136_v18  ;;  %vm242_vm3 = vcmp.eq.s32.totalorder %v1120_v61, %v1136_v18 }
 0x2c1   :  { %v243_v19 = vsel %vm239_vm14, -inf, %v1093_v32  ;;  %v244_v20 = vsel %vm240_vm15, -inf, %v1095_v34  ;;  %v245_v21 = vsel %vm241_vm2, -inf, %v1101_v38  ;;  %v246_v22 = vsel %vm242_vm3, -inf, %v1103_v39 }
 0x2c2   :  { %v247_v23 = vmax.f32 %v243_v19, %v244_v20  ;;  %v248_v24 = vmax.f32 %v245_v21, %v246_v22 }
 0x2c4   :  { %v249_v25 = vmax.f32 %v247_v23, %v248_v24 }
 0x2c6   :  { %250 = vmax.xlane.f32.xlu1 %v249_v25 }
 0x339   :  { %v1150_v26 = vpop.xlane.xlu1 %250 }
 0x33a   :  { %vm252_vm4 = vcmp.eq.f32.partialorder %v243_v19, %v1150_v26  ;;  %vm253_vm5 = vcmp.eq.f32.partialorder %v244_v20, %v1150_v26  ;;  %vm254_vm6 = vcmp.eq.f32.partialorder %v245_v21, %v1150_v26  ;;  %vm255_vm7 = vcmp.eq.f32.partialorder %v246_v22, %v1150_v26 }
 0x33b   :  { %v256_v27 = vsel %vm252_vm4, %v1076_v3, 1073741824  ;;  %v257_v28 = vsel %vm253_vm5, %v1114_v59, 1073741824  ;;  %v258_v29 = vsel %vm254_vm6, %v1117_v60, 1073741824  ;;  %v259_v30 = vsel %vm255_vm7, %v1120_v61, 1073741824 }
 0x33c   :  { %vm260_vm8 = vcmp.lt.s32.totalorder %v256_v27, %v257_v28  ;;  %vm262_vm9 = vcmp.lt.s32.totalorder %v258_v29, %v259_v30 }
 0x33d   :  { %v261_v32 = vsel %vm260_vm8, %v256_v27, %v257_v28  ;;  %v263_v33 = vsel %vm262_vm9, %v258_v29, %v259_v30 }
 0x33e   :  { %vm264_vm10 = vcmp.lt.s32.totalorder %v261_v32, %v263_v33 }
 0x33f   :  { %v265_v34 = vsel %vm264_vm10, %v261_v32, %v263_v33  ;;  %vm362_vm10 = vcmask 7168  }
 0x340   :  { %v267_v36 = vshra.s32 %v265_v34, 16  ;;  %v266_v38 = vand.u32 65535, %v265_v34 }
 0x342   :  { %v269_v37 = vcvt.s32.f32 %v267_v36  ;;  %v268_v40 = vcvt.s32.f32 %v266_v38  ;;  %v371_v38 = vld [vmem:[#allocation2] sm:$0xff] }
 0x344   :  { %270 = vmin.xlane.f32.xlu2 %v269_v37 }
 0x3b7   :  { %v271_v39 = vpop.xlane.xlu2 %270 }
 0x3b8   :  { %vm272_vm11 = vcmp.eq.f32.partialorder %v269_v37, %v271_v39  ;;  %v277_v42 = vcvt.f32.s32 %v271_v39 }
 0x3b9   :  { %v273_v41 = vsel %vm272_vm11, %v268_v40, inf  ;;  %vm364_vm11 = vcmask 15360  }
 0x3ba   :  { %274 = vmin.xlane.f32.xlu2 %v273_v41  ;;  %v278_v44 = vshll.u32 %v277_v42, 16 }
 0x42d   :  { %v275_v43 = vpop.xlane.xlu2 %274 }
 0x42e   :  { %v276_v45 = vcvt.f32.s32 %v275_v43 }
 0x430   :  { %v279_v46 = vadd.s32 %v278_v44, %v276_v45 }
 0x432   :  { %vm280_vm12 = vcmp.eq.s32.totalorder %v1076_v3, %v279_v46  ;;  %vm281_vm13 = vcmp.eq.s32.totalorder %v1114_v59, %v279_v46  ;;  %vm282_vm14 = vcmp.eq.s32.totalorder %v1117_v60, %v279_v46  ;;  %vm283_vm15 = vcmp.eq.s32.totalorder %v1120_v61, %v279_v46 }
 0x433   :  { %v284_v47 = vsel %vm280_vm12, -inf, %v243_v19  ;;  %v285_v48 = vsel %vm281_vm13, -inf, %v244_v20  ;;  %v286_v49 = vsel %vm282_vm14, -inf, %v245_v21  ;;  %v287_v50 = vsel %vm283_vm15, -inf, %v246_v22 }
 0x434   :  { %v288_v51 = vmax.f32 %v284_v47, %v285_v48  ;;  %v289_v52 = vmax.f32 %v286_v49, %v287_v50  ;;  %v368_v15 = vsel %vm362_vm10, %v1136_v18, %v279_v46  ;;  %v363_v18 = vsel %vm362_vm10, %v1122_v62, %v1150_v26 }
 0x436   :  { %v290_v53 = vmax.f32 %v288_v51, %v289_v52 }
 0x438   :  { %291 = vmax.xlane.f32.xlu0 %v290_v53 }
 0x4ab   :  { %v292_v54 = vpop.xlane.xlu0 %291 }
 0x4ac   :  { %vm293_vm2 = vcmp.eq.f32.partialorder %v284_v47, %v292_v54  ;;  %vm294_vm3 = vcmp.eq.f32.partialorder %v285_v48, %v292_v54  ;;  %vm295_vm4 = vcmp.eq.f32.partialorder %v286_v49, %v292_v54  ;;  %vm296_vm5 = vcmp.eq.f32.partialorder %v287_v50, %v292_v54 }
 0x4ad   :  { %v297_v55 = vsel %vm293_vm2, %v1076_v3, 1073741824  ;;  %v298_v56 = vsel %vm294_vm3, %v1114_v59, 1073741824  ;;  %v299_v57 = vsel %vm295_vm4, %v1117_v60, 1073741824  ;;  %v300_v58 = vsel %vm296_vm5, %v1120_v61, 1073741824 }
 0x4ae   :  { %vm301_vm6 = vcmp.lt.s32.totalorder %v297_v55, %v298_v56  ;;  %vm303_vm7 = vcmp.lt.s32.totalorder %v299_v57, %v300_v58  ;;  %vm366_vm2 = vcmask 23552   ;;  %v365_v27 = vsel %vm364_vm11, %v363_v18, %v292_v54 }
 0x4af   :  { %v302_v63 = vsel %vm301_vm6, %v297_v55, %v298_v56  ;;  %v304_v1 = vsel %vm303_vm7, %v299_v57, %v300_v58 }
 0x4b0   :  { %vm305_vm8 = vcmp.lt.s32.totalorder %v302_v63, %v304_v1 }
 0x4b1   :  { %v306_v2 = vsel %vm305_vm8, %v302_v63, %v304_v1 }
 0x4b2   :  { %v308_v4 = vshra.s32 %v306_v2, 16  ;;  %v307_v6 = vand.u32 65535, %v306_v2 }
 0x4b4   :  { %v310_v5 = vcvt.s32.f32 %v308_v4  ;;  %v309_v8 = vcvt.s32.f32 %v307_v6 }
 0x4b6   :  { %311 = vmin.xlane.f32.xlu1 %v310_v5 }
 0x529   :  { %v312_v7 = vpop.xlane.xlu1 %311 }
 0x52a   :  { %vm313_vm9 = vcmp.eq.f32.partialorder %v310_v5, %v312_v7  ;;  %v318_v10 = vcvt.f32.s32 %v312_v7 }
 0x52b   :  { %v314_v9 = vsel %vm313_vm9, %v309_v8, inf }
 0x52c   :  { %315 = vmin.xlane.f32.xlu2 %v314_v9  ;;  %v319_v12 = vshll.u32 %v318_v10, 16 }
 0x59f   :  { %v316_v11 = vpop.xlane.xlu2 %315 }
 0x5a0   :  { %v317_v13 = vcvt.f32.s32 %v316_v11 }
 0x5a2   :  { %v320_v14 = vadd.s32 %v319_v12, %v317_v13 }
 0x5a4   :  { %vm321_vm12 = vcmp.eq.s32.totalorder %v1076_v3, %v320_v14  ;;  %vm322_vm13 = vcmp.eq.s32.totalorder %v1114_v59, %v320_v14  ;;  %vm323_vm14 = vcmp.eq.s32.totalorder %v1117_v60, %v320_v14  ;;  %vm324_vm15 = vcmp.eq.s32.totalorder %v1120_v61, %v320_v14 }
 0x5a5   :  { %v325_v16 = vsel %vm321_vm12, -inf, %v284_v47  ;;  %v326_v17 = vsel %vm322_vm13, -inf, %v285_v48  ;;  %v327_v19 = vsel %vm323_vm14, -inf, %v286_v49  ;;  %v328_v20 = vsel %vm324_vm15, -inf, %v287_v50  ;;  %v378_v50 = vld [vmem:[#allocation3] sm:$0xff] }
 0x5a6   :  { %v329_v21 = vmax.f32 %v325_v16, %v326_v17  ;;  %v330_v22 = vmax.f32 %v327_v19, %v328_v20  ;;  %v369_v23 = vsel %vm364_vm11, %v368_v15, %v320_v14  ;;  %vm382_vm12 = vcmask 64512  }
 0x5a8   :  { %v331_v24 = vmax.f32 %v329_v21, %v330_v22 }
 0x5aa   :  { %332 = vmax.xlane.f32.xlu0 %v331_v24 }
 0x61d   :  { %v333_v25 = vpop.xlane.xlu0 %332 }
 0x61e   :  { %v367_v28 = vsel %vm366_vm2, %v365_v27, %v333_v25  ;;  %vm334_vm3 = vcmp.eq.f32.partialorder %v325_v16, %v333_v25  ;;  %vm335_vm4 = vcmp.eq.f32.partialorder %v326_v17, %v333_v25  ;;  %vm336_vm5 = vcmp.eq.f32.partialorder %v327_v19, %v333_v25 }
 0x61f   :  { %373 = vrot.lane.b32.xlu0 %v367_v28, %s1049_s20  ;;  %vm337_vm6 = vcmp.eq.f32.partialorder %v328_v20, %v333_v25  ;;  %v338_v29 = vsel %vm334_vm3, %v1076_v3, 1073741824  ;;  %v339_v30 = vsel %vm335_vm4, %v1114_v59, 1073741824  ;;  %v340_v32 = vsel %vm336_vm5, %v1117_v60, 1073741824 }
 0x620   :  { %v341_v62 = vsel %vm337_vm6, %v1120_v61, 1073741824  ;;  %vm342_vm7 = vcmp.lt.s32.totalorder %v338_v29, %v339_v30 }
 0x621   :  { %v343_v26 = vsel %vm342_vm7, %v338_v29, %v339_v30  ;;  %vm344_vm8 = vcmp.lt.s32.totalorder %v340_v32, %v341_v62 }
 0x622   :  { %v345_v33 = vsel %vm344_vm8, %v340_v32, %v341_v62 }
 0x623   :  { %vm346_vm9 = vcmp.lt.s32.totalorder %v343_v26, %v345_v33 }
 0x624   :  { %v347_v34 = vsel %vm346_vm9, %v343_v26, %v345_v33 }
 0x625   :  { %v349_v36 = vshra.s32 %v347_v34, 16  ;;  %v348_v60 = vand.u32 65535, %v347_v34 }
 0x627   :  { %v351_v37 = vcvt.s32.f32 %v349_v36  ;;  %v350_v61 = vcvt.s32.f32 %v348_v60 }
 0x629   :  { %352 = vmin.xlane.f32.xlu1 %v351_v37 }
 0x691   :  { %v374_v39 = vpop.permute.xlu0 %373 }
 0x692   :  { %v377_v40 = vsel %vm41_vm0, %v371_v38, %v374_v39 }
 0x693   :  { %v383_v59 = vsel %vm382_vm12, %v377_v40, -inf }
 0x694   :  { %384 = vmax.xlane.f32.xlu1 %v383_v59 }
 0x69c   :  { %v353_v41 = vpop.xlane.xlu1 %352 }
 0x69d   :  { %vm354_vm13 = vcmp.eq.f32.partialorder %v351_v37, %v353_v41  ;;  %v359_v43 = vcvt.f32.s32 %v353_v41 }
 0x69e   :  { %v355_v42 = vsel %vm354_vm13, %v350_v61, inf }
 0x69f   :  { %356 = vmin.xlane.f32.xlu2 %v355_v42  ;;  %v360_v45 = vshll.u32 %v359_v43, 16 }
 0x707   :  { %v1189_v49 = vpop.xlane.xlu1 %384 }
 0x708   :  { %vm386_vm14 = vcmp.eq.f32.partialorder %v377_v40, %v1189_v49 }
 0x712   :  { %v357_v44 = vpop.xlane.xlu2 %356 }
 0x713   :  { %v358_v46 = vcvt.f32.s32 %v357_v44 }
 0x715   :  { %v361_v47 = vadd.s32 %v360_v45, %v358_v46 }
 0x717   :  { %v370_v48 = vsel %vm366_vm2, %v369_v23, %v361_v47 }
 0x718   :  { %379 = vrot.lane.b32.xlu2 %v370_v48, %s1049_s20 }
 0x772   :  { %v380_v51 = vpop.permute.xlu2 %379 }
 0x773   :  { %v1193_v52 = vsel %vm41_vm0, %v378_v50, %v380_v51 }
 0x774   :  { %v387_v53 = vsel %vm386_vm14, %v1193_v52, 1073741824 }
 0x775   :  { %v388_v54 = vsel %vm382_vm12, %v387_v53, 2147483647 }
 0x776   :  { %v390_v55 = vshra.s32 %v388_v54, 16  ;;  %v389_v57 = vand.u32 65535, %v388_v54 }
 0x778   :  { %v392_v56 = vcvt.s32.f32 %v390_v55  ;;  %v391_v63 = vcvt.s32.f32 %v389_v57 }
 0x77a   :  { %393 = vmin.xlane.f32.xlu1 %v392_v56 }
 0x7ed   :  { %v394_v58 = vpop.xlane.xlu1 %393 }
 0x7ee   :  { %vm395_vm15 = vcmp.eq.f32.partialorder %v392_v56, %v394_v58  ;;  %v400_v2 = vcvt.f32.s32 %v394_v58 }
 0x7ef   :  { %v396_v1 = vsel %vm395_vm15, %v391_v63, inf }
 0x7f0   :  { %397 = vmin.xlane.f32.xlu1 %v396_v1  ;;  %v401_v5 = vshll.u32 %v400_v2, 16 }
 0x863   :  { %v398_v4 = vpop.xlane.xlu1 %397 }
 0x864   :  { %v399_v6 = vcvt.f32.s32 %v398_v4 }
 0x866   :  { %v402_v7 = vadd.s32 %v401_v5, %v399_v6 }
 0x868   :  { %vm403_vm3 = vcmp.eq.s32.totalorder %v1193_v52, %v402_v7 }
 0x869   :  { %v404_v8 = vsel %vm403_vm3, -inf, %v377_v40 }
 0x86a   :  { %v405_v9 = vsel %vm382_vm12, %v404_v8, -inf }
 0x86b   :  { %406 = vmax.xlane.f32.xlu0 %v405_v9 }
 0x8de   :  { %v407_v10 = vpop.xlane.xlu0 %406 }
 0x8df   :  { %vm408_vm4 = vcmp.eq.f32.partialorder %v404_v8, %v407_v10  ;;  %v469_v42 = vsel %vm362_vm10, %v1189_v49, %v407_v10 }
 0x8e0   :  { %v409_v11 = vsel %vm408_vm4, %v1193_v52, 1073741824 }
 0x8e1   :  { %v410_v12 = vsel %vm382_vm12, %v409_v11, 2147483647 }
 0x8e2   :  { %v412_v13 = vshra.s32 %v410_v12, 16  ;;  %v411_v15 = vand.u32 65535, %v410_v12 }
 0x8e4   :  { %v414_v14 = vcvt.s32.f32 %v412_v13  ;;  %v413_v17 = vcvt.s32.f32 %v411_v15 }
 0x8e6   :  { %415 = vmin.xlane.f32.xlu1 %v414_v14 }
 0x959   :  { %v416_v16 = vpop.xlane.xlu1 %415 }
 0x95a   :  { %vm417_vm5 = vcmp.eq.f32.partialorder %v414_v14, %v416_v16  ;;  %v422_v20 = vcvt.f32.s32 %v416_v16 }
 0x95b   :  { %v418_v19 = vsel %vm417_vm5, %v413_v17, inf }
 0x95c   :  { %419 = vmin.xlane.f32.xlu2 %v418_v19  ;;  %v423_v22 = vshll.u32 %v422_v20, 16 }
 0x9cf   :  { %v420_v21 = vpop.xlane.xlu2 %419 }
 0x9d0   :  { %v421_v23 = vcvt.f32.s32 %v420_v21 }
 0x9d2   :  { %v424_v24 = vadd.s32 %v423_v22, %v421_v23 }
 0x9d4   :  { %vm425_vm6 = vcmp.eq.s32.totalorder %v1193_v52, %v424_v24  ;;  %v472_v59 = vsel %vm362_vm10, %v402_v7, %v424_v24 }
 0x9d5   :  { %v426_v18 = vsel %vm425_vm6, -inf, %v404_v8 }
 0x9d6   :  { %v427_v25 = vsel %vm382_vm12, %v426_v18, -inf }
 0x9d7   :  { %428 = vmax.xlane.f32.xlu1 %v427_v25 }
 0xa4a   :  { %v429_v27 = vpop.xlane.xlu1 %428 }
 0xa4b   :  { %vm430_vm7 = vcmp.eq.f32.partialorder %v426_v18, %v429_v27  ;;  %v470_v43 = vsel %vm364_vm11, %v469_v42, %v429_v27 }
 0xa4c   :  { %v431_v28 = vsel %vm430_vm7, %v1193_v52, 1073741824 }
 0xa4d   :  { %v432_v29 = vsel %vm382_vm12, %v431_v28, 2147483647 }
 0xa4e   :  { %v434_v30 = vshra.s32 %v432_v29, 16  ;;  %v433_v62 = vand.u32 65535, %v432_v29 }
 0xa50   :  { %v436_v32 = vcvt.s32.f32 %v434_v30  ;;  %v435_v33 = vcvt.s32.f32 %v433_v62 }
 0xa52   :  { %437 = vmin.xlane.f32.xlu1 %v436_v32 }
 0xac5   :  { %v438_v26 = vpop.xlane.xlu1 %437 }
 0xac6   :  { %vm439_vm8 = vcmp.eq.f32.partialorder %v436_v32, %v438_v26  ;;  %v444_v36 = vcvt.f32.s32 %v438_v26 }
 0xac7   :  { %v440_v34 = vsel %vm439_vm8, %v435_v33, inf }
 0xac8   :  { %441 = vmin.xlane.f32.xlu1 %v440_v34  ;;  %v445_v38 = vshll.u32 %v444_v36, 16 }
 0xb3b   :  { %v442_v37 = vpop.xlane.xlu1 %441 }
 0xb3c   :  { %v443_v39 = vcvt.f32.s32 %v442_v37 }
 0xb3e   :  { %v446_v40 = vadd.s32 %v445_v38, %v443_v39 }
 0xb40   :  { %v473_v60 = vsel %vm364_vm11, %v472_v59, %v446_v40  ;;  %vm447_vm9 = vcmp.eq.s32.totalorder %v1193_v52, %v446_v40 }
 0xb41   :  { %v448_v41 = vsel %vm447_vm9, -inf, %v426_v18 }
 0xb42   :  { %v449_v61 = vsel %vm382_vm12, %v448_v41, -inf }
 0xb43   :  { %450 = vmax.xlane.f32.xlu1 %v449_v61 }
 0xbb6   :  { %v451_v44 = vpop.xlane.xlu1 %450 }
 0xbb7   :  { %vm452_vm13 = vcmp.eq.f32.partialorder %v448_v41, %v451_v44  ;;  %v471_v45 = vsel %vm366_vm2, %v470_v43, %v451_v44 }
 0xbb8   :  { %v453_v46 = vsel %vm452_vm13, %v1193_v52, 1073741824  ;;  %475 = vst.msk [vmem:[#allocation2] sm:$0xff] %vm41_vm0, %v471_v45 }
 0xbb9   :  { %v454_v47 = vsel %vm382_vm12, %v453_v46, 2147483647 }
 0xbba   :  { %v456_v48 = vshra.s32 %v454_v47, 16  ;;  %v455_v51 = vand.u32 65535, %v454_v47 }
 0xbbc   :  { %v458_v50 = vcvt.s32.f32 %v456_v48  ;;  %v457_v54 = vcvt.s32.f32 %v455_v51 }
 0xbbe   :  { %459 = vmin.xlane.f32.xlu0 %v458_v50 }
 0xc31   :  { %v460_v53 = vpop.xlane.xlu0 %459 }
 0xc32   :  { %vm461_vm14 = vcmp.eq.f32.partialorder %v458_v50, %v460_v53  ;;  %v466_v55 = vcvt.f32.s32 %v460_v53 }
 0xc33   :  { %v462_v49 = vsel %vm461_vm14, %v457_v54, inf }
 0xc34   :  { %463 = vmin.xlane.f32.xlu1 %v462_v49  ;;  %v467_v57 = vshll.u32 %v466_v55, 16 }
 0xca7   :  { %v464_v56 = vpop.xlane.xlu1 %463 }
 0xca8   :  { %v465_v58 = vcvt.f32.s32 %v464_v56 }
 0xcaa   :  { %v468_v63 = vadd.s32 %v467_v57, %v465_v58 }
 0xcac   :  { %v474_v52 = vsel %vm366_vm2, %v473_v60, %v468_v63 }
 0xcad   :  { %476 = vst.msk [vmem:[#allocation3] sm:$0xff] %vm41_vm0, %v474_v52 }
 0xcae PF:  { %v969_v1 = vld [vmem:[#allocation4 + $0x60] sm:$0xf]  ;;  %v1001_v2 = vld [vmem:[#allocation4 + $0x6c] sm:$0xf0]  ;;  %v999_v4 = vld [vmem:[#allocation4 + $0x64] sm:$0xf]  ;;  %1016 = vset.pattern.permute.xlu0 %v1046_v0 }
 0xcaf   :  { %v970_v5 = vor.u32 %v1001_v2, %v969_v1  ;;  %v971_v6 = vld [vmem:[#allocation4 + $0x70] sm:$0xf0]  ;;  %v977_v7 = vld [vmem:[#allocation4 + $0x68] sm:$0xf]  ;;  %v1002_v8 = vld [vmem:[#allocation4 + $0x74] sm:$0xf0] }
 0xcb0   :  { %v974_v9 = vor.u32 %v999_v4, %v971_v6  ;;  %v978_v10 = vor.u32 %v1002_v8, %v977_v7  ;;  %v1000_v11 = vld [vmem:[#allocation4 + $0x6c] sm:$0xf]  ;;  %v979_v12 = vld [vmem:[#allocation4 + $0x78] sm:$0xf0]  ;;  %v953_v13 = vld [vmem:[#allocation4 + $0x40] sm:$0xf] }
 0xcb1   :  { %532 = vmatpush.bf16.msrb.mxu0 %v970_v5  ;;  %v982_v14 = vor.u32 %v1000_v11, %v979_v12  ;;  %v997_v15 = vld [vmem:[#allocation4 + $0x4c] sm:$0xf0]  ;;  %v995_v16 = vld [vmem:[#allocation4 + $0x44] sm:$0xf]  ;;  %v955_v17 = vld [vmem:[#allocation4 + $0x50] sm:$0xf0] }
 0xcb2   :  { %545 = vmatpush.bf16.msrb.mxu1 %v974_v9  ;;  %558 = vmatpush.bf16.msrb.mxu2 %v978_v10  ;;  %v954_v19 = vor.u32 %v997_v15, %v953_v13  ;;  %v958_v20 = vor.u32 %v995_v16, %v955_v17  ;;  %v961_v21 = vld [vmem:[#allocation4 + $0x48] sm:$0xf]  ;;  %v998_v0 = vld [vmem:[#allocation4 + $0x54] sm:$0xf0]  ;;  %v996_v22 = vld [vmem:[#allocation4 + $0x4c] sm:$0xf] }
 0xcb3   :  { %571 = vmatpush.bf16.msrb.mxu3 %v982_v14  ;;  %v962_v23 = vor.u32 %v998_v0, %v961_v21  ;;  %v963_v24 = vld [vmem:[#allocation4 + $0x58] sm:$0xf0]  ;;  %v578_v18 = vld [vmem:[#allocation2] sm:$0xff] }
 0xcb4   :  { %v966_v25 = vor.u32 %v996_v22, %v963_v24  ;;  %581 = vperm.xlu0 %1016, %v578_v18  }
 0xcb5   :  { %533 = vmatpush.bf16.msrb.mxu0 %v954_v19 }
 0xcb6   :  { %546 = vmatpush.bf16.msrb.mxu1 %v958_v20  ;;  %559 = vmatpush.bf16.msrb.mxu2 %v962_v23 }
 0xcb7   :  { %572 = vmatpush.bf16.msrb.mxu3 %v966_v25 }
 0xcb8   :  { %983 = vmatmul.msk.bf16.vlgmr.msrb.gmra.mxu0 %vm102_vm1, %v1083_v31 }
 0xcb9   :  { %984 = vmatmul.msk.bf16.vlgmr.msrb.gmra.mxu1 %vm102_vm1, %v1083_v31  ;;  %985 = vmatmul.msk.bf16.vlgmr.msrb.gmra.mxu2 %vm102_vm1, %v1083_v31 }
 0xcba   :  { %986 = vmatmul.msk.bf16.vlgmr.msrb.gmra.mxu3 %vm102_vm1, %v1083_v31 }
 0xd26   :  { %v582_v28 = vpop.permute.xlu0 %581 }
 0xd35   :  { %v1227_v27 = vpop.f32.mrf.mxu0 }
 0xd36   :  { %v1229_v29 = vpop.f32.mrf.mxu1  ;;  %vm584_vm10 = vcmp.gt.f32.partialorder %v1227_v27, %v582_v28 }
 0xd37   :  { %vm585_vm11 = vcmp.gt.f32.partialorder %v1229_v29, %v582_v28  ;;  %v588_v30 = vsel %vm584_vm10, 1.0, %v1048_v35 }
 0xd38   :  { %v589_v32 = vsel %vm585_vm11, 1.0, %v1048_v35 }
 0xd39   :  { %v592_v36 = vmax.f32 %v588_v30, %v589_v32 }
 0xd3c   :  { %v1235_v62 = vpop.f32.mrf.mxu2 }
 0xd3d   :  { %vm586_vm2 = vcmp.gt.f32.partialorder %v1235_v62, %v582_v28  ;;  %v574_v26 = vpop.f32.mrf.mxu3  ;;  %v537_v33 = vpop.f32.mrf.mxu0 }
 0xd3e   :  { %v590_v31 = vsel %vm586_vm2, 1.0, %v1048_v35  ;;  %vm587_vm1 = vcmp.gt.f32.partialorder %v574_v26, %v582_v28  ;;  %v550_v34 = vpop.f32.mrf.mxu1 }
 0xd3f   :  { %v591_v37 = vsel %vm587_vm1, 1.0, %v1048_v35 }
 0xd40   :  { %v593_v38 = vmax.f32 %v590_v31, %v591_v37 }
 0xd42   :  { %v594_v39 = vmax.f32 %v592_v36, %v593_v38 }
 0xd44   :  { %595 = vmax.xlane.f32.xlu0 %v594_v39  ;;  %v563_v40 = vpop.f32.mrf.mxu2 }
 0xd45   :  { %v576_v59 = vpop.f32.mrf.mxu3 }
 0xdb7   :  { %v596_v60 = vpop.xlane.xlu0 %595 }
 0xdb8   :  { %v597_v41 = vrot.slane %v596_v60, 4 }
 0xdba   :  { %v598_v61 = vmax.f32 %v596_v60, %v597_v41 }
 0xdbc   :  { %v599_v42 = vrot.slane %v598_v61, 2 }
 0xdbe   :  { %v600_v43 = vmax.f32 %v598_v61, %v599_v42 }
 0xdc0   :  { %v601_v44 = vrot.slane %v600_v43, 1 }
 0xdc2   :  { %v602_v45 = vmax.f32 %v600_v43, %v601_v44 }
 0xdc4   :  { %1005 = vpush %v602_v45 }
 0xdf5   :  { %s1006_s21 = spop %1005 }
 0xdf6   :  { %p604_p1 = scmp.gt.f32.partialorder %s1006_s21, 0.0 }
 0xdf7   :  { %v613_v46 = vadd.s32 (%p604_p1), 384, %v1076_v3  ;;  %v627_v35 = vmax.f32 (%p604_p1), %v1227_v27, %v1229_v29  ;;  %v611_v53 = vadd.s32 (%p604_p1), 128, %v1076_v3  ;;  %v612_v54 = vadd.s32 (%p604_p1), 256, %v1076_v3  ;;  %s1050_s22 = smov (%p604_p1), 4  }
 0xdf8   :  { %607 = sbr.rel (!%p604_p1) target bundleno = 6491 (0x195b), region = 25  ;;  %v1250_v49 = vadd.s32 (%p604_p1), 512, %v1076_v3 }
 0xdf9   :  { %v1241_v47 = vadd.s32 (%p604_p1), 512, %v613_v46  ;;  %v1252_v55 = vadd.s32 (%p604_p1), 512, %v611_v53  ;;  %v1254_v56 = vadd.s32 (%p604_p1), 512, %v612_v54 }
 0xdfb   :  { %vm622_vm12 = vcmp.lt.s32.totalorder (%p604_p1), %v1241_v47, 1000 }
 0xdfc   :  { %v626_v48 = vsel (%p604_p1), %vm622_vm12, %v574_v26, -inf }
 0xdfd   :  { %v628_v50 = vmax.f32 %v1235_v62, %v626_v48 }
 0xdff   :  { %v629_v51 = vmax.f32 %v627_v35, %v628_v50 }
 0xe01   :  { %630 = vmax.xlane.f32.xlu0 %v629_v51 }
 0xe74   :  { %v1256_v57 = vpop.xlane.xlu0 %630 }
 0xe75   :  { %vm632_vm15 = vcmp.eq.f32.partialorder %v1227_v27, %v1256_v57  ;;  %vm633_vm3 = vcmp.eq.f32.partialorder %v1229_v29, %v1256_v57  ;;  %vm634_vm4 = vcmp.eq.f32.partialorder %v1235_v62, %v1256_v57  ;;  %vm635_vm5 = vcmp.eq.f32.partialorder %v626_v48, %v1256_v57 }
 0xe76   :  { %v636_v3 = vsel %vm632_vm15, %v1250_v49, 1073741824  ;;  %v637_v58 = vsel %vm633_vm3, %v1252_v55, 1073741824  ;;  %v638_v63 = vsel %vm634_vm4, %v1254_v56, 1073741824  ;;  %v639_v52 = vsel %vm635_vm5, %v1241_v47, 1073741824 }
 0xe77   :  { %vm640_vm6 = vcmp.lt.s32.totalorder %v636_v3, %v637_v58  ;;  %vm642_vm7 = vcmp.lt.s32.totalorder %v638_v63, %v639_v52 }
 0xe78   :  { %v641_v1 = vsel %vm640_vm6, %v636_v3, %v637_v58  ;;  %v643_v2 = vsel %vm642_vm7, %v638_v63, %v639_v52 }
 0xe79   :  { %vm644_vm8 = vcmp.lt.s32.totalorder %v641_v1, %v643_v2 }
 0xe7a   :  { %v645_v4 = vsel %vm644_vm8, %v641_v1, %v643_v2 }
 0xe7b   :  { %v647_v5 = vshra.s32 %v645_v4, 16  ;;  %v646_v7 = vand.u32 65535, %v645_v4 }
 0xe7d   :  { %v649_v6 = vcvt.s32.f32 %v647_v5  ;;  %v648_v9 = vcvt.s32.f32 %v646_v7 }
 0xe7f   :  { %650 = vmin.xlane.f32.xlu0 %v649_v6 }
 0xef2   :  { %v651_v8 = vpop.xlane.xlu0 %650 }
 0xef3   :  { %vm652_vm9 = vcmp.eq.f32.partialorder %v649_v6, %v651_v8  ;;  %v657_v11 = vcvt.f32.s32 %v651_v8 }
 0xef4   :  { %v653_v10 = vsel %vm652_vm9, %v648_v9, inf }
 0xef5   :  { %654 = vmin.xlane.f32.xlu1 %v653_v10  ;;  %v658_v13 = vshll.u32 %v657_v11, 16 }
 0xf68   :  { %v655_v12 = vpop.xlane.xlu1 %654 }
 0xf69   :  { %v656_v14 = vcvt.f32.s32 %v655_v12 }
 0xf6b   :  { %v1269_v15 = vadd.s32 %v658_v13, %v656_v14 }
 0xf6d   :  { %vm660_vm13 = vcmp.eq.s32.totalorder %v1250_v49, %v1269_v15  ;;  %vm661_vm14 = vcmp.eq.s32.totalorder %v1252_v55, %v1269_v15  ;;  %vm662_vm10 = vcmp.eq.s32.totalorder %v1254_v56, %v1269_v15  ;;  %vm663_vm11 = vcmp.eq.s32.totalorder %v1241_v47, %v1269_v15 }
 0xf6e   :  { %v664_v16 = vsel %vm660_vm13, -inf, %v1227_v27  ;;  %v665_v17 = vsel %vm661_vm14, -inf, %v1229_v29  ;;  %v666_v19 = vsel %vm662_vm10, -inf, %v1235_v62  ;;  %v667_v20 = vsel %vm663_vm11, -inf, %v626_v48 }
 0xf6f   :  { %v668_v21 = vmax.f32 %v664_v16, %v665_v17  ;;  %v669_v0 = vmax.f32 %v666_v19, %v667_v20 }
 0xf71   :  { %v670_v22 = vmax.f32 %v668_v21, %v669_v0 }
 0xf73   :  { %671 = vmax.xlane.f32.xlu1 %v670_v22 }
 0xfe6   :  { %v1282_v23 = vpop.xlane.xlu1 %671 }
 0xfe7   :  { %vm673_vm2 = vcmp.eq.f32.partialorder %v664_v16, %v1282_v23  ;;  %vm674_vm1 = vcmp.eq.f32.partialorder %v665_v17, %v1282_v23  ;;  %vm675_vm12 = vcmp.eq.f32.partialorder %v666_v19, %v1282_v23  ;;  %vm676_vm15 = vcmp.eq.f32.partialorder %v667_v20, %v1282_v23 }
 0xfe8   :  { %v677_v24 = vsel %vm673_vm2, %v1250_v49, 1073741824  ;;  %v678_v18 = vsel %vm674_vm1, %v1252_v55, 1073741824  ;;  %v679_v25 = vsel %vm675_vm12, %v1254_v56, 1073741824  ;;  %v680_v27 = vsel %vm676_vm15, %v1241_v47, 1073741824 }
 0xfe9   :  { %vm681_vm3 = vcmp.lt.s32.totalorder %v677_v24, %v678_v18  ;;  %vm683_vm4 = vcmp.lt.s32.totalorder %v679_v25, %v680_v27 }
 0xfea   :  { %v682_v28 = vsel %vm681_vm3, %v677_v24, %v678_v18  ;;  %v684_v29 = vsel %vm683_vm4, %v679_v25, %v680_v27  ;;  %vm783_vm4 = vcmask 7168  }
 0xfeb   :  { %vm685_vm5 = vcmp.lt.s32.totalorder %v682_v28, %v684_v29 }
 0xfec   :  { %v686_v30 = vsel %vm685_vm5, %v682_v28, %v684_v29  ;;  %vm785_vm5 = vcmask 15360  }
 0xfed   :  { %v688_v32 = vshra.s32 %v686_v30, 16  ;;  %v687_v26 = vand.u32 65535, %v686_v30  ;;  %v792_v30 = vld [vmem:[#allocation2] sm:$0xff] }
 0xfef   :  { %v690_v62 = vcvt.s32.f32 %v688_v32  ;;  %v689_v31 = vcvt.s32.f32 %v687_v26 }
 0xff1   :  { %691 = vmin.xlane.f32.xlu2 %v690_v62 }
0x1064   :  { %v692_v33 = vpop.xlane.xlu2 %691 }
0x1065   :  { %vm693_vm6 = vcmp.eq.f32.partialorder %v690_v62, %v692_v33  ;;  %v698_v36 = vcvt.f32.s32 %v692_v33 }
0x1066   :  { %v694_v34 = vsel %vm693_vm6, %v689_v31, inf }
0x1067   :  { %695 = vmin.xlane.f32.xlu2 %v694_v34  ;;  %v699_v38 = vshll.u32 %v698_v36, 16 }
0x10da   :  { %v696_v37 = vpop.xlane.xlu2 %695 }
0x10db   :  { %v697_v39 = vcvt.f32.s32 %v696_v37 }
0x10dd   :  { %v700_v40 = vadd.s32 %v699_v38, %v697_v39 }
0x10df   :  { %vm701_vm7 = vcmp.eq.s32.totalorder %v1250_v49, %v700_v40  ;;  %vm702_vm8 = vcmp.eq.s32.totalorder %v1252_v55, %v700_v40  ;;  %vm703_vm9 = vcmp.eq.s32.totalorder %v1254_v56, %v700_v40  ;;  %vm704_vm13 = vcmp.eq.s32.totalorder %v1241_v47, %v700_v40 }
0x10e0   :  { %v705_v59 = vsel %vm701_vm7, -inf, %v664_v16  ;;  %v706_v60 = vsel %vm702_vm8, -inf, %v665_v17  ;;  %v707_v41 = vsel %vm703_vm9, -inf, %v666_v19  ;;  %v708_v61 = vsel %vm704_vm13, -inf, %v667_v20 }
0x10e1   :  { %v709_v42 = vmax.f32 %v705_v59, %v706_v60  ;;  %v710_v43 = vmax.f32 %v707_v41, %v708_v61  ;;  %v789_v9 = vsel %vm783_vm4, %v1269_v15, %v700_v40  ;;  %vm787_vm13 = vcmask 23552   ;;  %v799_v40 = vld [vmem:[#allocation3] sm:$0xff] }
0x10e2   :  { %v784_v15 = vsel %vm783_vm4, %v1256_v57, %v1282_v23 }
0x10e3   :  { %v711_v44 = vmax.f32 %v709_v42, %v710_v43 }
0x10e5   :  { %712 = vmax.xlane.f32.xlu0 %v711_v44 }
0x1158   :  { %v713_v45 = vpop.xlane.xlu0 %712 }
0x1159   :  { %vm714_vm14 = vcmp.eq.f32.partialorder %v705_v59, %v713_v45  ;;  %vm715_vm10 = vcmp.eq.f32.partialorder %v706_v60, %v713_v45  ;;  %vm716_vm11 = vcmp.eq.f32.partialorder %v707_v41, %v713_v45  ;;  %vm717_vm2 = vcmp.eq.f32.partialorder %v708_v61, %v713_v45 }
0x115a   :  { %v718_v46 = vsel %vm714_vm14, %v1250_v49, 1073741824  ;;  %v719_v35 = vsel %vm715_vm10, %v1252_v55, 1073741824  ;;  %v720_v48 = vsel %vm716_vm11, %v1254_v56, 1073741824  ;;  %v721_v50 = vsel %vm717_vm2, %v1241_v47, 1073741824 }
0x115b   :  { %vm722_vm1 = vcmp.lt.s32.totalorder %v718_v46, %v719_v35  ;;  %vm724_vm12 = vcmp.lt.s32.totalorder %v720_v48, %v721_v50  ;;  %v786_v21 = vsel %vm785_vm5, %v784_v15, %v713_v45 }
0x115c   :  { %v723_v51 = vsel %vm722_vm1, %v718_v46, %v719_v35  ;;  %v725_v53 = vsel %vm724_vm12, %v720_v48, %v721_v50 }
0x115d   :  { %vm726_vm15 = vcmp.lt.s32.totalorder %v723_v51, %v725_v53 }
0x115e   :  { %v727_v54 = vsel %vm726_vm15, %v723_v51, %v725_v53 }
0x115f   :  { %v729_v3 = vshra.s32 %v727_v54, 16  ;;  %v728_v63 = vand.u32 65535, %v727_v54 }
0x1161   :  { %v731_v58 = vcvt.s32.f32 %v729_v3  ;;  %v730_v1 = vcvt.s32.f32 %v728_v63 }
0x1163   :  { %732 = vmin.xlane.f32.xlu1 %v731_v58 }
0x11d6   :  { %v733_v52 = vpop.xlane.xlu1 %732 }
0x11d7   :  { %vm734_vm3 = vcmp.eq.f32.partialorder %v731_v58, %v733_v52  ;;  %v739_v4 = vcvt.f32.s32 %v733_v52 }
0x11d8   :  { %v735_v2 = vsel %vm734_vm3, %v730_v1, inf  ;;  %vm803_vm3 = vcmask 64512  }
0x11d9   :  { %736 = vmin.xlane.f32.xlu2 %v735_v2  ;;  %v740_v6 = vshll.u32 %v739_v4, 16 }
0x124c   :  { %v737_v5 = vpop.xlane.xlu2 %736 }
0x124d   :  { %v738_v7 = vcvt.f32.s32 %v737_v5 }
0x124f   :  { %v741_v8 = vadd.s32 %v740_v6, %v738_v7 }
0x1251   :  { %vm742_vm6 = vcmp.eq.s32.totalorder %v1250_v49, %v741_v8  ;;  %vm743_vm7 = vcmp.eq.s32.totalorder %v1252_v55, %v741_v8  ;;  %vm744_vm8 = vcmp.eq.s32.totalorder %v1254_v56, %v741_v8  ;;  %vm745_vm9 = vcmp.eq.s32.totalorder %v1241_v47, %v741_v8 }
0x1252   :  { %v746_v10 = vsel %vm742_vm6, -inf, %v705_v59  ;;  %v747_v11 = vsel %vm743_vm7, -inf, %v706_v60  ;;  %v748_v12 = vsel %vm744_vm8, -inf, %v707_v41  ;;  %v749_v13 = vsel %vm745_vm9, -inf, %v708_v61 }
0x1253   :  { %v750_v14 = vmax.f32 %v746_v10, %v747_v11  ;;  %v751_v16 = vmax.f32 %v748_v12, %v749_v13  ;;  %v790_v17 = vsel %vm785_vm5, %v789_v9, %v741_v8 }
0x1255   :  { %v752_v19 = vmax.f32 %v750_v14, %v751_v16 }
0x1257   :  { %753 = vmax.xlane.f32.xlu0 %v752_v19 }
0x12ca   :  { %v754_v20 = vpop.xlane.xlu0 %753 }
0x12cb   :  { %v788_v0 = vsel %vm787_vm13, %v786_v21, %v754_v20  ;;  %vm755_vm14 = vcmp.eq.f32.partialorder %v746_v10, %v754_v20  ;;  %vm756_vm10 = vcmp.eq.f32.partialorder %v747_v11, %v754_v20  ;;  %vm757_vm11 = vcmp.eq.f32.partialorder %v748_v12, %v754_v20 }
0x12cc   :  { %794 = vrot.lane.b32.xlu0 %v788_v0, %s1050_s22  ;;  %vm758_vm2 = vcmp.eq.f32.partialorder %v749_v13, %v754_v20  ;;  %v759_v22 = vsel %vm755_vm14, %v1250_v49, 1073741824  ;;  %v760_v24 = vsel %vm756_vm10, %v1252_v55, 1073741824  ;;  %v761_v18 = vsel %vm757_vm11, %v1254_v56, 1073741824 }
0x12cd   :  { %v762_v57 = vsel %vm758_vm2, %v1241_v47, 1073741824  ;;  %vm763_vm1 = vcmp.lt.s32.totalorder %v759_v22, %v760_v24 }
0x12ce   :  { %v764_v23 = vsel %vm763_vm1, %v759_v22, %v760_v24  ;;  %vm765_vm12 = vcmp.lt.s32.totalorder %v761_v18, %v762_v57 }
0x12cf   :  { %v766_v25 = vsel %vm765_vm12, %v761_v18, %v762_v57 }
0x12d0   :  { %vm767_vm15 = vcmp.lt.s32.totalorder %v764_v23, %v766_v25 }
0x12d1   :  { %v768_v27 = vsel %vm767_vm15, %v764_v23, %v766_v25 }
0x12d2   :  { %v770_v28 = vshra.s32 %v768_v27, 16  ;;  %v769_v56 = vand.u32 65535, %v768_v27 }
0x12d4   :  { %v772_v29 = vcvt.s32.f32 %v770_v28  ;;  %v771_v47 = vcvt.s32.f32 %v769_v56 }
0x12d6   :  { %773 = vmin.xlane.f32.xlu1 %v772_v29 }
0x133e   :  { %v795_v32 = vpop.permute.xlu0 %794 }
0x133f   :  { %v798_v49 = vsel %vm41_vm0, %v792_v30, %v795_v32 }
0x1340   :  { %v804_v55 = vsel %vm803_vm3, %v798_v49, -inf }
0x1341   :  { %805 = vmax.xlane.f32.xlu1 %v804_v55 }
0x1349   :  { %v774_v62 = vpop.xlane.xlu1 %773 }
0x134a   :  { %vm775_vm6 = vcmp.eq.f32.partialorder %v772_v29, %v774_v62  ;;  %v780_v33 = vcvt.f32.s32 %v774_v62 }
0x134b   :  { %v776_v26 = vsel %vm775_vm6, %v771_v47, inf }
0x134c   :  { %777 = vmin.xlane.f32.xlu2 %v776_v26  ;;  %v781_v34 = vshll.u32 %v780_v33, 16 }
0x13b4   :  { %v1321_v39 = vpop.xlane.xlu1 %805 }
0x13b5   :  { %vm807_vm7 = vcmp.eq.f32.partialorder %v798_v49, %v1321_v39 }
0x13bf   :  { %v778_v31 = vpop.xlane.xlu2 %777 }
0x13c0   :  { %v779_v36 = vcvt.f32.s32 %v778_v31 }
0x13c2   :  { %v782_v37 = vadd.s32 %v781_v34, %v779_v36 }
0x13c4   :  { %v791_v38 = vsel %vm787_vm13, %v790_v17, %v782_v37 }
0x13c5   :  { %800 = vrot.lane.b32.xlu2 %v791_v38, %s1050_s22 }
0x141f   :  { %v801_v59 = vpop.permute.xlu2 %800 }
0x1420   :  { %v1325_v60 = vsel %vm41_vm0, %v799_v40, %v801_v59 }
0x1421   :  { %v808_v41 = vsel %vm807_vm7, %v1325_v60, 1073741824 }
0x1422   :  { %v809_v61 = vsel %vm803_vm3, %v808_v41, 2147483647 }
0x1423   :  { %v811_v42 = vshra.s32 %v809_v61, 16  ;;  %v810_v44 = vand.u32 65535, %v809_v61 }
0x1425   :  { %v813_v43 = vcvt.s32.f32 %v811_v42  ;;  %v812_v46 = vcvt.s32.f32 %v810_v44 }
0x1427   :  { %814 = vmin.xlane.f32.xlu1 %v813_v43 }
0x149a   :  { %v815_v45 = vpop.xlane.xlu1 %814 }
0x149b   :  { %vm816_vm8 = vcmp.eq.f32.partialorder %v813_v43, %v815_v45  ;;  %v821_v48 = vcvt.f32.s32 %v815_v45 }
0x149c   :  { %v817_v35 = vsel %vm816_vm8, %v812_v46, inf }
0x149d   :  { %818 = vmin.xlane.f32.xlu1 %v817_v35  ;;  %v822_v51 = vshll.u32 %v821_v48, 16 }
0x1510   :  { %v819_v50 = vpop.xlane.xlu1 %818 }
0x1511   :  { %v820_v53 = vcvt.f32.s32 %v819_v50 }
0x1513   :  { %v823_v54 = vadd.s32 %v822_v51, %v820_v53 }
0x1515   :  { %vm824_vm9 = vcmp.eq.s32.totalorder %v1325_v60, %v823_v54 }
0x1516   :  { %v825_v3 = vsel %vm824_vm9, -inf, %v798_v49 }
0x1517   :  { %v826_v58 = vsel %vm803_vm3, %v825_v3, -inf }
0x1518   :  { %827 = vmax.xlane.f32.xlu0 %v826_v58 }
0x158b   :  { %v828_v63 = vpop.xlane.xlu0 %827 }
0x158c   :  { %vm829_vm14 = vcmp.eq.f32.partialorder %v825_v3, %v828_v63  ;;  %v890_v55 = vsel %vm783_vm4, %v1321_v39, %v828_v63 }
0x158d   :  { %v830_v52 = vsel %vm829_vm14, %v1325_v60, 1073741824 }
0x158e   :  { %v831_v1 = vsel %vm803_vm3, %v830_v52, 2147483647 }
0x158f   :  { %v833_v2 = vshra.s32 %v831_v1, 16  ;;  %v832_v5 = vand.u32 65535, %v831_v1 }
0x1591   :  { %v835_v4 = vcvt.s32.f32 %v833_v2  ;;  %v834_v7 = vcvt.s32.f32 %v832_v5 }
0x1593   :  { %836 = vmin.xlane.f32.xlu1 %v835_v4 }
0x1606   :  { %v837_v6 = vpop.xlane.xlu1 %836 }
0x1607   :  { %vm838_vm10 = vcmp.eq.f32.partialorder %v835_v4, %v837_v6  ;;  %v843_v9 = vcvt.f32.s32 %v837_v6 }
0x1608   :  { %v839_v8 = vsel %vm838_vm10, %v834_v7, inf }
0x1609   :  { %840 = vmin.xlane.f32.xlu2 %v839_v8  ;;  %v844_v11 = vshll.u32 %v843_v9, 16 }
0x167c   :  { %v841_v10 = vpop.xlane.xlu2 %840 }
0x167d   :  { %v842_v12 = vcvt.f32.s32 %v841_v10 }
0x167f   :  { %v845_v13 = vadd.s32 %v844_v11, %v842_v12 }
0x1681   :  { %vm846_vm11 = vcmp.eq.s32.totalorder %v1325_v60, %v845_v13  ;;  %v893_v29 = vsel %vm783_vm4, %v823_v54, %v845_v13 }
0x1682   :  { %v847_v14 = vsel %vm846_vm11, -inf, %v825_v3 }
0x1683   :  { %v848_v16 = vsel %vm803_vm3, %v847_v14, -inf }
0x1684   :  { %849 = vmax.xlane.f32.xlu1 %v848_v16 }
0x16f7   :  { %v850_v17 = vpop.xlane.xlu1 %849 }
0x16f8   :  { %vm851_vm2 = vcmp.eq.f32.partialorder %v847_v14, %v850_v17  ;;  %v891_v56 = vsel %vm785_vm5, %v890_v55, %v850_v17 }
0x16f9   :  { %v852_v19 = vsel %vm851_vm2, %v1325_v60, 1073741824 }
0x16fa   :  { %v853_v15 = vsel %vm803_vm3, %v852_v19, 2147483647 }
0x16fb   :  { %v855_v20 = vshra.s32 %v853_v15, 16  ;;  %v854_v0 = vand.u32 65535, %v853_v15 }
0x16fd   :  { %v857_v21 = vcvt.s32.f32 %v855_v20  ;;  %v856_v24 = vcvt.s32.f32 %v854_v0 }
0x16ff   :  { %858 = vmin.xlane.f32.xlu1 %v857_v21 }
0x1772   :  { %v859_v22 = vpop.xlane.xlu1 %858 }
0x1773   :  { %vm860_vm1 = vcmp.eq.f32.partialorder %v857_v21, %v859_v22  ;;  %v865_v57 = vcvt.f32.s32 %v859_v22 }
0x1774   :  { %v861_v18 = vsel %vm860_vm1, %v856_v24, inf }
0x1775   :  { %862 = vmin.xlane.f32.xlu1 %v861_v18  ;;  %v866_v25 = vshll.u32 %v865_v57, 16 }
0x17e8   :  { %v863_v23 = vpop.xlane.xlu1 %862 }
0x17e9   :  { %v864_v27 = vcvt.f32.s32 %v863_v23 }
0x17eb   :  { %v867_v28 = vadd.s32 %v866_v25, %v864_v27 }
0x17ed   :  { %v894_v30 = vsel %vm785_vm5, %v893_v29, %v867_v28  ;;  %vm868_vm12 = vcmp.eq.s32.totalorder %v1325_v60, %v867_v28 }
0x17ee   :  { %v869_v32 = vsel %vm868_vm12, -inf, %v847_v14 }
0x17ef   :  { %v870_v49 = vsel %vm803_vm3, %v869_v32, -inf }
0x17f0   :  { %871 = vmax.xlane.f32.xlu1 %v870_v49 }
0x1863   :  { %v872_v62 = vpop.xlane.xlu1 %871 }
0x1864   :  { %vm873_vm15 = vcmp.eq.f32.partialorder %v869_v32, %v872_v62  ;;  %v892_v47 = vsel %vm787_vm13, %v891_v56, %v872_v62 }
0x1865   :  { %v874_v26 = vsel %vm873_vm15, %v1325_v60, 1073741824  ;;  %896 = vst.msk [vmem:[#allocation2] sm:$0xff] %vm41_vm0, %v892_v47 }
0x1866   :  { %v875_v33 = vsel %vm803_vm3, %v874_v26, 2147483647 }
0x1867   :  { %v877_v31 = vshra.s32 %v875_v33, 16  ;;  %v876_v36 = vand.u32 65535, %v875_v33 }
0x1869   :  { %v879_v34 = vcvt.s32.f32 %v877_v31  ;;  %v878_v38 = vcvt.s32.f32 %v876_v36 }
0x186b   :  { %880 = vmin.xlane.f32.xlu0 %v879_v34 }
0x18de   :  { %v881_v37 = vpop.xlane.xlu0 %880 }
0x18df   :  { %vm882_vm6 = vcmp.eq.f32.partialorder %v879_v34, %v881_v37  ;;  %v887_v40 = vcvt.f32.s32 %v881_v37 }
0x18e0   :  { %v883_v39 = vsel %vm882_vm6, %v878_v38, inf }
0x18e1   :  { %884 = vmin.xlane.f32.xlu1 %v883_v39  ;;  %v888_v41 = vshll.u32 %v887_v40, 16 }
0x1954   :  { %v885_v59 = vpop.xlane.xlu1 %884 }
0x1955   :  { %v886_v61 = vcvt.f32.s32 %v885_v59 }
0x1957   :  { %v889_v42 = vadd.s32 %v888_v41, %v886_v61 }
0x1959   :  { %v895_v60 = vsel %vm787_vm13, %v894_v30, %v889_v42 }
0x195a   :  { %897 = vst.msk [vmem:[#allocation3] sm:$0xff] %vm41_vm0, %v895_v60 }
0x195b PF:  { %v901_v43 = vld [vmem:[#allocation2] sm:$0xff] }
0x195c   :  { %903 = vst.msk [vmem:[%s1360_s2] sm:$0xff] %vm41_vm0, %v901_v43 }
0x1961   :  { %v904_v44 = vld [vmem:[#allocation3] sm:$0xff] }
0x1962   :  { %905 = vst.msk [vmem:[%s1361_s3] sm:$0xff] %vm41_vm0, %v904_v44 }
0x1963   :  { %914 = vsyncpa [#allocation5], 1 }

</bundles_post_ra>
